<compile_context>
chip_gen: v5e
topology: v5e:2x2
jax: 0.10.0
libtpu: 0.0.40
codegen_flags: <defaults>
</compile_context>

<pallas_src>
import math

import jax
import jax.numpy as jnp
from jax.experimental import pallas as pl
from jax.experimental.pallas import tpu as pltpu


def _make_kernel(num_head: int, d_model: int, ln_eps: float):

    def kernel(x_ref, wq_ref, bq_ref, wk_ref, bk_ref, wv_ref, bv_ref,
               wo_ref, bo_ref, gamma_ref, beta_ref, out_ref):
        bt, seq, dm = x_ref.shape                       # (batch_tile, seq, d_model)
        rows = bt * seq

        x = x_ref[...]                                  # native dtype
        dt = x.dtype
        # Leading-dim merge only (rows stay rows): no lane-crossing relayout.
        x2 = x.reshape(rows, dm)

        # Accumulator for sum_h ctx_h @ Wo_h  (== concat_h(ctx_h) @ Wo).
        acc = jnp.zeros((rows, dm), jnp.float32)

        # num_head is small & static -> unrolled Python loop; every weight
        # access is a leading-axis index on the ref (no lane slicing).
        for h in range(num_head):
            # Per-head projections on the MXU, f32 accumulation.
            # 1/sqrt(d_model) is already folded into wq/bq by the wrapper.
            q = jnp.dot(x2, wq_ref[h], preferred_element_type=jnp.float32)
            q = q + bq_ref[h].astype(jnp.float32)
            k = jnp.dot(x2, wk_ref[h], preferred_element_type=jnp.float32)
            k = k + bk_ref[h].astype(jnp.float32)
            v = jnp.dot(x2, wv_ref[h], preferred_element_type=jnp.float32)
            v = v + bv_ref[h].astype(jnp.float32)

            # Back to the input dtype before the attention matmuls so bf16
            # inputs use the bf16 MXU path; leading-dim split is layout-free.
            qb = q.astype(dt).reshape(bt, seq, dm)
            kb = k.astype(dt).reshape(bt, seq, dm)
            vb = v.astype(dt).reshape(bt, seq, dm)

            # logits = q @ k^T per batch element (scale pre-folded into q).
            a = jnp.einsum('bld,bmd->blm', qb, kb,
                           preferred_element_type=jnp.float32)   # (bt, seq, seq)

            # Numerically stable softmax over the key axis.
            m = jnp.max(a, axis=-1, keepdims=True)
            e = jnp.exp(a - m)
            s = jnp.sum(e, axis=-1, keepdims=True)
            alpha = e * pl.reciprocal(s, approx=True)            # EUP rcp

            ctx = jnp.einsum('blm,bmd->bld', alpha.astype(dt), vb,
                             preferred_element_type=jnp.float32)  # (bt, seq, dm)

            # Output projection for this head, accumulated in f32.
            acc = acc + jnp.dot(ctx.astype(dt).reshape(rows, dm), wo_ref[h],
                                preferred_element_type=jnp.float32)

        # Residual + LayerNorm (f32 math).
        y = acc + bo_ref[...].astype(jnp.float32) + x2.astype(jnp.float32)
        mu = jnp.mean(y, axis=-1, keepdims=True)
        var = jnp.mean(jnp.square(y - mu), axis=-1, keepdims=True)
        y = (y - mu) * jax.lax.rsqrt(var + ln_eps)
        y = y * gamma_ref[...].astype(jnp.float32) + beta_ref[...].astype(jnp.float32)

        out_ref[...] = y.reshape(bt, seq, dm).astype(out_ref.dtype)

    return kernel


def self_attention_prompt(x, wq, bq, wk, bk, wv, bv, wo, bo, gamma, beta,
                          *, num_head: int, d_model: int, ln_eps: float = 1e-5,
                          batch_tile: int | None = None,
                          vmem_limit_bytes: int | None = None):
    """x: (batch, seq, d_model); weights pre-transposed for x @ W:
       wq/wk/wv: (d_model, H*d_model), bq/bk/bv: (1, H*d_model),
       wo: (H*d_model, d_model), bo/gamma/beta: (1, d_model)."""
    batch, seq, dm = x.shape
    assert dm == d_model
    hd = num_head * d_model
    assert wq.shape == (d_model, hd) and wo.shape == (hd, d_model)

    if batch_tile is None:
        batch_tile = batch                      # whole batch in one grid step
    assert batch % batch_tile == 0

    # --- trace-time weight massaging (outside the kernel, done once per call) ---
    # Fold the attention scale into the Q projection (module scales by
    # sqrt(d_model); head_dim == d_model here so this matches the reference).
    inv_scale = 1.0 / math.sqrt(d_model)
    # Head-major layout (H, d_model, d_model): kernel indexes heads on the
    # leading axis and never lane-slices activations or concatenates heads.
    wq3 = (wq * inv_scale).reshape(d_model, num_head, d_model).transpose(1, 0, 2)
    wk3 = wk.reshape(d_model, num_head, d_model).transpose(1, 0, 2)
    wv3 = wv.reshape(d_model, num_head, d_model).transpose(1, 0, 2)
    wo3 = wo.reshape(num_head, d_model, d_model)
    bq3 = (bq * inv_scale).reshape(num_head, 1, d_model)
    bk3 = bk.reshape(num_head, 1, d_model)
    bv3 = bv.reshape(num_head, 1, d_model)

    kernel = _make_kernel(num_head, d_model, ln_eps)

    resident3 = lambda i: (0, 0, 0)   # same block every step -> stays in VMEM
    resident2 = lambda i: (0, 0)

    grid = (batch // batch_tile,)

    return pl.pallas_call(
        kernel,
        out_shape=jax.ShapeDtypeStruct((batch, seq, d_model), x.dtype),
        grid=grid,
        in_specs=[
            pl.BlockSpec((batch_tile, seq, d_model), lambda i: (i, 0, 0)),   # x
            pl.BlockSpec((num_head, d_model, d_model), resident3),           # wq
            pl.BlockSpec((num_head, 1, d_model), resident3),                 # bq
            pl.BlockSpec((num_head, d_model, d_model), resident3),           # wk
            pl.BlockSpec((num_head, 1, d_model), resident3),                 # bk
            pl.BlockSpec((num_head, d_model, d_model), resident3),           # wv
            pl.BlockSpec((num_head, 1, d_model), resident3),                 # bv
            pl.BlockSpec((num_head, d_model, d_model), resident3),           # wo
            pl.BlockSpec((1, d_model), resident2),                           # bo
            pl.BlockSpec((1, d_model), resident2),                           # gamma
            pl.BlockSpec((1, d_model), resident2),                           # beta
        ],
        out_specs=pl.BlockSpec((batch_tile, seq, d_model), lambda i: (i, 0, 0)),
        # "arbitrary": at small per-step work, sharding the batch axis across
        # TensorCores just duplicates weight DMAs; switch to "parallel" only
        # when batch_tile*seq carries enough compute to amortize it.
        compiler_params=pltpu.CompilerParams(
            dimension_semantics=("arbitrary",),
            vmem_limit_bytes=vmem_limit_bytes),
    )(x, wq3, bq3, wk3, bk3, wv3, bv3, wo3, bo, gamma, beta)


def self_attention_prompt_reference(x, wq, bq, wk, bk, wv, bv, wo, bo, gamma,
                                    beta, *, num_head, d_model, ln_eps=1e-5):
    """Pure-JAX mirror of the PyTorch forward (eval mode)."""
    b, l, _ = x.shape
    scale = math.sqrt(d_model)
    qp = x @ wq + bq
    kp = x @ wk + bk
    vp = x @ wv + bv

    def heads(t):
        return t.reshape(b, l, num_head, d_model).transpose(0, 2, 1, 3)

    qh, kh, vh = heads(qp), heads(kp), heads(vp)
    a = jnp.einsum('bhld,bhmd->bhlm', qh, kh) / scale
    alpha = jax.nn.softmax(a, axis=-1)
    ctx = jnp.einsum('bhlm,bhmd->bhld', alpha, vh)
    ctx = ctx.transpose(0, 2, 1, 3).reshape(b, l, num_head * d_model)
    y = ctx @ wo + bo + x
    mu = jnp.mean(y, axis=-1, keepdims=True)
    var = jnp.mean((y - mu) ** 2, axis=-1, keepdims=True)
    y = (y - mu) / jnp.sqrt(var + ln_eps)
    return y * gamma + beta


if __name__ == "__main__":
    # Small shapes consistent with the module: d_model=32, num_head=4,
    # batch=2, seq=8 (H*d_model = 128 keeps the projections lane-dense).
    d_model, num_head = 32, 4
    batch, seq = 2, 8
    hd = num_head * d_model

    key = jax.random.PRNGKey(0)
    ks = jax.random.split(key, 11)

    x = jax.random.normal(ks[0], (batch, seq, d_model), dtype=jnp.float32)

    def xavier(k, shape):
        fan_in, fan_out = shape
        bound = math.sqrt(6.0 / (fan_in + fan_out))
        return jax.random.uniform(k, shape, minval=-bound, maxval=bound,
                                  dtype=jnp.float32)

    # nn.Linear weights stored transposed: (in_features, out_features).
    wq = xavier(ks[1], (d_model, hd))
    wk = xavier(ks[2], (d_model, hd))
    wv = xavier(ks[3], (d_model, hd))
    wo = xavier(ks[4], (hd, d_model))
    bq = 0.1 * jax.random.normal(ks[5], (1, hd), dtype=jnp.float32)
    bk = 0.1 * jax.random.normal(ks[6], (1, hd), dtype=jnp.float32)
    bv = 0.1 * jax.random.normal(ks[7], (1, hd), dtype=jnp.float32)
    bo = 0.1 * jax.random.normal(ks[8], (1, d_model), dtype=jnp.float32)
    gamma = 1.0 + 0.1 * jax.random.normal(ks[9], (1, d_model), dtype=jnp.float32)
    beta = 0.1 * jax.random.normal(ks[10], (1, d_model), dtype=jnp.float32)

    out = self_attention_prompt(x, wq, bq, wk, bk, wv, bv, wo, bo, gamma, beta,
                                num_head=num_head, d_model=d_model)
    out = jax.block_until_ready(out)

    ref = self_attention_prompt_reference(x, wq, bq, wk, bk, wv, bv, wo, bo,
                                          gamma, beta,
                                          num_head=num_head, d_model=d_model)

    # Tolerance loosened vs 1e-5 because the softmax uses the EUP approximate
    # reciprocal (~2^-12 relative error); real bugs produce O(1) errors.
    err = float(jnp.max(jnp.abs(out - ref)))
    assert jnp.allclose(out, ref, atol=5e-3, rtol=5e-3), f"max abs err={err}"

    print("KERNEL_OK")
</pallas_src>

<mosaic_0001>
module attributes {stable_mosaic.version = 11 : i64} {
  func.func @kernel(%arg0: i32, %arg1: memref<2x8x32xf32, #tpu.memory_space<vmem>>, %arg2: memref<4x32x32xf32, #tpu.memory_space<vmem>>, %arg3: memref<4x1x32xf32, #tpu.memory_space<vmem>>, %arg4: memref<4x32x32xf32, #tpu.memory_space<vmem>>, %arg5: memref<4x1x32xf32, #tpu.memory_space<vmem>>, %arg6: memref<4x32x32xf32, #tpu.memory_space<vmem>>, %arg7: memref<4x1x32xf32, #tpu.memory_space<vmem>>, %arg8: memref<4x32x32xf32, #tpu.memory_space<vmem>>, %arg9: memref<1x32xf32, #tpu.memory_space<vmem>>, %arg10: memref<1x32xf32, #tpu.memory_space<vmem>>, %arg11: memref<1x32xf32, #tpu.memory_space<vmem>>, %arg12: memref<2x8x32xf32, #tpu.memory_space<vmem>>) attributes {dimension_semantics = [#tpu.dimension_semantics<arbitrary>], iteration_bounds = array<i64: 1>, scalar_prefetch = 0 : i64, scratch_operands = 0 : i64, tpu.core_type = #tpu.core_type<tc>, window_params = [{transform_indices = @transform_0, window_bounds = array<i64: 2, 8, 32>}, {pipeline_mode = #tpu.pipeline_mode<synchronous>, transform_indices = @transform_1, window_bounds = array<i64: 4, 32, 32>}, {pipeline_mode = #tpu.pipeline_mode<synchronous>, transform_indices = @transform_2, window_bounds = array<i64: 4, 1, 32>}, {pipeline_mode = #tpu.pipeline_mode<synchronous>, transform_indices = @transform_3, window_bounds = array<i64: 4, 32, 32>}, {pipeline_mode = #tpu.pipeline_mode<synchronous>, transform_indices = @transform_4, window_bounds = array<i64: 4, 1, 32>}, {pipeline_mode = #tpu.pipeline_mode<synchronous>, transform_indices = @transform_5, window_bounds = array<i64: 4, 32, 32>}, {pipeline_mode = #tpu.pipeline_mode<synchronous>, transform_indices = @transform_6, window_bounds = array<i64: 4, 1, 32>}, {pipeline_mode = #tpu.pipeline_mode<synchronous>, transform_indices = @transform_7, window_bounds = array<i64: 4, 32, 32>}, {pipeline_mode = #tpu.pipeline_mode<synchronous>, transform_indices = @transform_8, window_bounds = array<i64: 1, 32>}, {pipeline_mode = #tpu.pipeline_mode<synchronous>, transform_indices = @transform_9, window_bounds = array<i64: 1, 32>}, {pipeline_mode = #tpu.pipeline_mode<synchronous>, transform_indices = @transform_10, window_bounds = array<i64: 1, 32>}, {transform_indices = @transform_11, window_bounds = array<i64: 2, 8, 32>}]} {
    %c0 = arith.constant 0 : index
    %c0_0 = arith.constant 0 : index
    %c0_1 = arith.constant 0 : index
    %0 = vector.load %arg1[%c0, %c0_0, %c0_1] : memref<2x8x32xf32, #tpu.memory_space<vmem>>, vector<2x8x32xf32>
    %1 = vector.shape_cast %0 : vector<2x8x32xf32> to vector<16x32xf32>
    %cst = arith.constant 0.000000e+00 : f32
    %2 = vector.broadcast %cst : f32 to vector<16x32xf32>
    %c0_2 = arith.constant 0 : index
    %c0_3 = arith.constant 0 : index
    %c0_4 = arith.constant 0 : index
    %3 = vector.load %arg2[%c0_2, %c0_3, %c0_4] : memref<4x32x32xf32, #tpu.memory_space<vmem>>, vector<1x32x32xf32>
    %4 = vector.shape_cast %3 : vector<1x32x32xf32> to vector<32x32xf32>
    %cst_5 = arith.constant dense<0.000000e+00> : vector<16x32xf32>
    %5 = tpu.matmul %1, %4, %cst_5 {dimension_numbers = #tpu.dot_dimension_numbers<[1], [0], [0], [1], [0, 0, 1, 1], [], []>} : vector<16x32xf32>, vector<32x32xf32>, vector<16x32xf32> -> vector<16x32xf32>
    %c0_6 = arith.constant 0 : index
    %c0_7 = arith.constant 0 : index
    %c0_8 = arith.constant 0 : index
    %6 = vector.load %arg3[%c0_6, %c0_7, %c0_8] : memref<4x1x32xf32, #tpu.memory_space<vmem>>, vector<1x1x32xf32>
    %7 = vector.shape_cast %6 : vector<1x1x32xf32> to vector<1x32xf32>
    %8 = vector.broadcast %7 : vector<1x32xf32> to vector<16x32xf32>
    %9 = arith.addf %5, %8 : vector<16x32xf32>
    %c0_9 = arith.constant 0 : index
    %c0_10 = arith.constant 0 : index
    %c0_11 = arith.constant 0 : index
    %10 = vector.load %arg4[%c0_9, %c0_10, %c0_11] : memref<4x32x32xf32, #tpu.memory_space<vmem>>, vector<1x32x32xf32>
    %11 = vector.shape_cast %10 : vector<1x32x32xf32> to vector<32x32xf32>
    %cst_12 = arith.constant dense<0.000000e+00> : vector<16x32xf32>
    %12 = tpu.matmul %1, %11, %cst_12 {dimension_numbers = #tpu.dot_dimension_numbers<[1], [0], [0], [1], [0, 0, 1, 1], [], []>} : vector<16x32xf32>, vector<32x32xf32>, vector<16x32xf32> -> vector<16x32xf32>
    %c0_13 = arith.constant 0 : index
    %c0_14 = arith.constant 0 : index
    %c0_15 = arith.constant 0 : index
    %13 = vector.load %arg5[%c0_13, %c0_14, %c0_15] : memref<4x1x32xf32, #tpu.memory_space<vmem>>, vector<1x1x32xf32>
    %14 = vector.shape_cast %13 : vector<1x1x32xf32> to vector<1x32xf32>
    %15 = vector.broadcast %14 : vector<1x32xf32> to vector<16x32xf32>
    %16 = arith.addf %12, %15 : vector<16x32xf32>
    %c0_16 = arith.constant 0 : index
    %c0_17 = arith.constant 0 : index
    %c0_18 = arith.constant 0 : index
    %17 = vector.load %arg6[%c0_16, %c0_17, %c0_18] : memref<4x32x32xf32, #tpu.memory_space<vmem>>, vector<1x32x32xf32>
    %18 = vector.shape_cast %17 : vector<1x32x32xf32> to vector<32x32xf32>
    %cst_19 = arith.constant dense<0.000000e+00> : vector<16x32xf32>
    %19 = tpu.matmul %1, %18, %cst_19 {dimension_numbers = #tpu.dot_dimension_numbers<[1], [0], [0], [1], [0, 0, 1, 1], [], []>} : vector<16x32xf32>, vector<32x32xf32>, vector<16x32xf32> -> vector<16x32xf32>
    %c0_20 = arith.constant 0 : index
    %c0_21 = arith.constant 0 : index
    %c0_22 = arith.constant 0 : index
    %20 = vector.load %arg7[%c0_20, %c0_21, %c0_22] : memref<4x1x32xf32, #tpu.memory_space<vmem>>, vector<1x1x32xf32>
    %21 = vector.shape_cast %20 : vector<1x1x32xf32> to vector<1x32xf32>
    %22 = vector.broadcast %21 : vector<1x32xf32> to vector<16x32xf32>
    %23 = arith.addf %19, %22 : vector<16x32xf32>
    %24 = vector.shape_cast %9 : vector<16x32xf32> to vector<2x8x32xf32>
    %25 = vector.shape_cast %16 : vector<16x32xf32> to vector<2x8x32xf32>
    %26 = vector.shape_cast %23 : vector<16x32xf32> to vector<2x8x32xf32>
    "tpu.trace_start"() <{level = 10 : i32, message = "bld,bmd->blm"}> : () -> ()
    %cst_23 = arith.constant dense<0.000000e+00> : vector<2x8x8xf32>
    %27 = tpu.matmul %24, %25, %cst_23 {dimension_numbers = #tpu.dot_dimension_numbers<[2], [2], [1], [1], [0, 0, 0, 1, 1, 1], [0], [0]>} : vector<2x8x32xf32>, vector<2x8x32xf32>, vector<2x8x8xf32> -> vector<2x8x8xf32>
    "tpu.trace_stop"() : () -> ()
    %cst_24 = arith.constant dense<0xFF800000> : vector<2x8xf32>
    %28 = vector.multi_reduction <maximumf>, %27, %cst_24 [2] : vector<2x8x8xf32> to vector<2x8xf32>
    %29 = vector.shape_cast %28 : vector<2x8xf32> to vector<2x8x1xf32>
    %30 = vector.broadcast %29 : vector<2x8x1xf32> to vector<2x8x8xf32>
    %31 = arith.subf %27, %30 : vector<2x8x8xf32>
    %32 = math.exp %31 : vector<2x8x8xf32>
    %cst_25 = arith.constant dense<0.000000e+00> : vector<2x8xf32>
    %33 = vector.multi_reduction <add>, %32, %cst_25 [2] : vector<2x8x8xf32> to vector<2x8xf32>
    %34 = vector.shape_cast %33 : vector<2x8xf32> to vector<2x8x1xf32>
    %35 = tpu.reciprocal %34 {approx = true} : vector<2x8x1xf32> -> vector<2x8x1xf32>
    %36 = vector.broadcast %35 : vector<2x8x1xf32> to vector<2x8x8xf32>
    %37 = arith.mulf %32, %36 : vector<2x8x8xf32>
    "tpu.trace_start"() <{level = 10 : i32, message = "blm,bmd->bld"}> : () -> ()
    %cst_26 = arith.constant dense<0.000000e+00> : vector<2x8x32xf32>
    %38 = tpu.matmul %37, %26, %cst_26 {dimension_numbers = #tpu.dot_dimension_numbers<[2], [1], [1], [2], [0, 0, 0, 1, 1, 2], [0], [0]>} : vector<2x8x8xf32>, vector<2x8x32xf32>, vector<2x8x32xf32> -> vector<2x8x32xf32>
    "tpu.trace_stop"() : () -> ()
    %39 = vector.shape_cast %38 : vector<2x8x32xf32> to vector<16x32xf32>
    %c0_27 = arith.constant 0 : index
    %c0_28 = arith.constant 0 : index
    %c0_29 = arith.constant 0 : index
    %40 = vector.load %arg8[%c0_27, %c0_28, %c0_29] : memref<4x32x32xf32, #tpu.memory_space<vmem>>, vector<1x32x32xf32>
    %41 = vector.shape_cast %40 : vector<1x32x32xf32> to vector<32x32xf32>
    %cst_30 = arith.constant dense<0.000000e+00> : vector<16x32xf32>
    %42 = tpu.matmul %39, %41, %cst_30 {dimension_numbers = #tpu.dot_dimension_numbers<[1], [0], [0], [1], [0, 0, 1, 1], [], []>} : vector<16x32xf32>, vector<32x32xf32>, vector<16x32xf32> -> vector<16x32xf32>
    %43 = arith.addf %2, %42 : vector<16x32xf32>
    %c1 = arith.constant 1 : index
    %c0_31 = arith.constant 0 : index
    %c0_32 = arith.constant 0 : index
    %44 = vector.load %arg2[%c1, %c0_31, %c0_32] : memref<4x32x32xf32, #tpu.memory_space<vmem>>, vector<1x32x32xf32>
    %45 = vector.shape_cast %44 : vector<1x32x32xf32> to vector<32x32xf32>
    %cst_33 = arith.constant dense<0.000000e+00> : vector<16x32xf32>
    %46 = tpu.matmul %1, %45, %cst_33 {dimension_numbers = #tpu.dot_dimension_numbers<[1], [0], [0], [1], [0, 0, 1, 1], [], []>} : vector<16x32xf32>, vector<32x32xf32>, vector<16x32xf32> -> vector<16x32xf32>
    %c1_34 = arith.constant 1 : index
    %c0_35 = arith.constant 0 : index
    %c0_36 = arith.constant 0 : index
    %47 = vector.load %arg3[%c1_34, %c0_35, %c0_36] : memref<4x1x32xf32, #tpu.memory_space<vmem>>, vector<1x1x32xf32>
    %48 = vector.shape_cast %47 : vector<1x1x32xf32> to vector<1x32xf32>
    %49 = vector.broadcast %48 : vector<1x32xf32> to vector<16x32xf32>
    %50 = arith.addf %46, %49 : vector<16x32xf32>
    %c1_37 = arith.constant 1 : index
    %c0_38 = arith.constant 0 : index
    %c0_39 = arith.constant 0 : index
    %51 = vector.load %arg4[%c1_37, %c0_38, %c0_39] : memref<4x32x32xf32, #tpu.memory_space<vmem>>, vector<1x32x32xf32>
    %52 = vector.shape_cast %51 : vector<1x32x32xf32> to vector<32x32xf32>
    %cst_40 = arith.constant dense<0.000000e+00> : vector<16x32xf32>
    %53 = tpu.matmul %1, %52, %cst_40 {dimension_numbers = #tpu.dot_dimension_numbers<[1], [0], [0], [1], [0, 0, 1, 1], [], []>} : vector<16x32xf32>, vector<32x32xf32>, vector<16x32xf32> -> vector<16x32xf32>
    %c1_41 = arith.constant 1 : index
    %c0_42 = arith.constant 0 : index
    %c0_43 = arith.constant 0 : index
    %54 = vector.load %arg5[%c1_41, %c0_42, %c0_43] : memref<4x1x32xf32, #tpu.memory_space<vmem>>, vector<1x1x32xf32>
    %55 = vector.shape_cast %54 : vector<1x1x32xf32> to vector<1x32xf32>
    %56 = vector.broadcast %55 : vector<1x32xf32> to vector<16x32xf32>
    %57 = arith.addf %53, %56 : vector<16x32xf32>
    %c1_44 = arith.constant 1 : index
    %c0_45 = arith.constant 0 : index
    %c0_46 = arith.constant 0 : index
    %58 = vector.load %arg6[%c1_44, %c0_45, %c0_46] : memref<4x32x32xf32, #tpu.memory_space<vmem>>, vector<1x32x32xf32>
    %59 = vector.shape_cast %58 : vector<1x32x32xf32> to vector<32x32xf32>
    %cst_47 = arith.constant dense<0.000000e+00> : vector<16x32xf32>
    %60 = tpu.matmul %1, %59, %cst_47 {dimension_numbers = #tpu.dot_dimension_numbers<[1], [0], [0], [1], [0, 0, 1, 1], [], []>} : vector<16x32xf32>, vector<32x32xf32>, vector<16x32xf32> -> vector<16x32xf32>
    %c1_48 = arith.constant 1 : index
    %c0_49 = arith.constant 0 : index
    %c0_50 = arith.constant 0 : index
    %61 = vector.load %arg7[%c1_48, %c0_49, %c0_50] : memref<4x1x32xf32, #tpu.memory_space<vmem>>, vector<1x1x32xf32>
    %62 = vector.shape_cast %61 : vector<1x1x32xf32> to vector<1x32xf32>
    %63 = vector.broadcast %62 : vector<1x32xf32> to vector<16x32xf32>
    %64 = arith.addf %60, %63 : vector<16x32xf32>
    %65 = vector.shape_cast %50 : vector<16x32xf32> to vector<2x8x32xf32>
    %66 = vector.shape_cast %57 : vector<16x32xf32> to vector<2x8x32xf32>
    %67 = vector.shape_cast %64 : vector<16x32xf32> to vector<2x8x32xf32>
    "tpu.trace_start"() <{level = 10 : i32, message = "bld,bmd->blm"}> : () -> ()
    %cst_51 = arith.constant dense<0.000000e+00> : vector<2x8x8xf32>
    %68 = tpu.matmul %65, %66, %cst_51 {dimension_numbers = #tpu.dot_dimension_numbers<[2], [2], [1], [1], [0, 0, 0, 1, 1, 1], [0], [0]>} : vector<2x8x32xf32>, vector<2x8x32xf32>, vector<2x8x8xf32> -> vector<2x8x8xf32>
    "tpu.trace_stop"() : () -> ()
    %cst_52 = arith.constant dense<0xFF800000> : vector<2x8xf32>
    %69 = vector.multi_reduction <maximumf>, %68, %cst_52 [2] : vector<2x8x8xf32> to vector<2x8xf32>
    %70 = vector.shape_cast %69 : vector<2x8xf32> to vector<2x8x1xf32>
    %71 = vector.broadcast %70 : vector<2x8x1xf32> to vector<2x8x8xf32>
    %72 = arith.subf %68, %71 : vector<2x8x8xf32>
    %73 = math.exp %72 : vector<2x8x8xf32>
    %cst_53 = arith.constant dense<0.000000e+00> : vector<2x8xf32>
    %74 = vector.multi_reduction <add>, %73, %cst_53 [2] : vector<2x8x8xf32> to vector<2x8xf32>
    %75 = vector.shape_cast %74 : vector<2x8xf32> to vector<2x8x1xf32>
    %76 = tpu.reciprocal %75 {approx = true} : vector<2x8x1xf32> -> vector<2x8x1xf32>
    %77 = vector.broadcast %76 : vector<2x8x1xf32> to vector<2x8x8xf32>
    %78 = arith.mulf %73, %77 : vector<2x8x8xf32>
    "tpu.trace_start"() <{level = 10 : i32, message = "blm,bmd->bld"}> : () -> ()
    %cst_54 = arith.constant dense<0.000000e+00> : vector<2x8x32xf32>
    %79 = tpu.matmul %78, %67, %cst_54 {dimension_numbers = #tpu.dot_dimension_numbers<[2], [1], [1], [2], [0, 0, 0, 1, 1, 2], [0], [0]>} : vector<2x8x8xf32>, vector<2x8x32xf32>, vector<2x8x32xf32> -> vector<2x8x32xf32>
    "tpu.trace_stop"() : () -> ()
    %80 = vector.shape_cast %79 : vector<2x8x32xf32> to vector<16x32xf32>
    %c1_55 = arith.constant 1 : index
    %c0_56 = arith.constant 0 : index
    %c0_57 = arith.constant 0 : index
    %81 = vector.load %arg8[%c1_55, %c0_56, %c0_57] : memref<4x32x32xf32, #tpu.memory_space<vmem>>, vector<1x32x32xf32>
    %82 = vector.shape_cast %81 : vector<1x32x32xf32> to vector<32x32xf32>
    %cst_58 = arith.constant dense<0.000000e+00> : vector<16x32xf32>
    %83 = tpu.matmul %80, %82, %cst_58 {dimension_numbers = #tpu.dot_dimension_numbers<[1], [0], [0], [1], [0, 0, 1, 1], [], []>} : vector<16x32xf32>, vector<32x32xf32>, vector<16x32xf32> -> vector<16x32xf32>
    %84 = arith.addf %43, %83 : vector<16x32xf32>
    %c2 = arith.constant 2 : index
    %c0_59 = arith.constant 0 : index
    %c0_60 = arith.constant 0 : index
    %85 = vector.load %arg2[%c2, %c0_59, %c0_60] : memref<4x32x32xf32, #tpu.memory_space<vmem>>, vector<1x32x32xf32>
    %86 = vector.shape_cast %85 : vector<1x32x32xf32> to vector<32x32xf32>
    %cst_61 = arith.constant dense<0.000000e+00> : vector<16x32xf32>
    %87 = tpu.matmul %1, %86, %cst_61 {dimension_numbers = #tpu.dot_dimension_numbers<[1], [0], [0], [1], [0, 0, 1, 1], [], []>} : vector<16x32xf32>, vector<32x32xf32>, vector<16x32xf32> -> vector<16x32xf32>
    %c2_62 = arith.constant 2 : index
    %c0_63 = arith.constant 0 : index
    %c0_64 = arith.constant 0 : index
    %88 = vector.load %arg3[%c2_62, %c0_63, %c0_64] : memref<4x1x32xf32, #tpu.memory_space<vmem>>, vector<1x1x32xf32>
    %89 = vector.shape_cast %88 : vector<1x1x32xf32> to vector<1x32xf32>
    %90 = vector.broadcast %89 : vector<1x32xf32> to vector<16x32xf32>
    %91 = arith.addf %87, %90 : vector<16x32xf32>
    %c2_65 = arith.constant 2 : index
    %c0_66 = arith.constant 0 : index
    %c0_67 = arith.constant 0 : index
    %92 = vector.load %arg4[%c2_65, %c0_66, %c0_67] : memref<4x32x32xf32, #tpu.memory_space<vmem>>, vector<1x32x32xf32>
    %93 = vector.shape_cast %92 : vector<1x32x32xf32> to vector<32x32xf32>
    %cst_68 = arith.constant dense<0.000000e+00> : vector<16x32xf32>
    %94 = tpu.matmul %1, %93, %cst_68 {dimension_numbers = #tpu.dot_dimension_numbers<[1], [0], [0], [1], [0, 0, 1, 1], [], []>} : vector<16x32xf32>, vector<32x32xf32>, vector<16x32xf32> -> vector<16x32xf32>
    %c2_69 = arith.constant 2 : index
    %c0_70 = arith.constant 0 : index
    %c0_71 = arith.constant 0 : index
    %95 = vector.load %arg5[%c2_69, %c0_70, %c0_71] : memref<4x1x32xf32, #tpu.memory_space<vmem>>, vector<1x1x32xf32>
    %96 = vector.shape_cast %95 : vector<1x1x32xf32> to vector<1x32xf32>
    %97 = vector.broadcast %96 : vector<1x32xf32> to vector<16x32xf32>
    %98 = arith.addf %94, %97 : vector<16x32xf32>
    %c2_72 = arith.constant 2 : index
    %c0_73 = arith.constant 0 : index
    %c0_74 = arith.constant 0 : index
    %99 = vector.load %arg6[%c2_72, %c0_73, %c0_74] : memref<4x32x32xf32, #tpu.memory_space<vmem>>, vector<1x32x32xf32>
    %100 = vector.shape_cast %99 : vector<1x32x32xf32> to vector<32x32xf32>
    %cst_75 = arith.constant dense<0.000000e+00> : vector<16x32xf32>
    %101 = tpu.matmul %1, %100, %cst_75 {dimension_numbers = #tpu.dot_dimension_numbers<[1], [0], [0], [1], [0, 0, 1, 1], [], []>} : vector<16x32xf32>, vector<32x32xf32>, vector<16x32xf32> -> vector<16x32xf32>
    %c2_76 = arith.constant 2 : index
    %c0_77 = arith.constant 0 : index
    %c0_78 = arith.constant 0 : index
    %102 = vector.load %arg7[%c2_76, %c0_77, %c0_78] : memref<4x1x32xf32, #tpu.memory_space<vmem>>, vector<1x1x32xf32>
    %103 = vector.shape_cast %102 : vector<1x1x32xf32> to vector<1x32xf32>
    %104 = vector.broadcast %103 : vector<1x32xf32> to vector<16x32xf32>
    %105 = arith.addf %101, %104 : vector<16x32xf32>
    %106 = vector.shape_cast %91 : vector<16x32xf32> to vector<2x8x32xf32>
    %107 = vector.shape_cast %98 : vector<16x32xf32> to vector<2x8x32xf32>
    %108 = vector.shape_cast %105 : vector<16x32xf32> to vector<2x8x32xf32>
    "tpu.trace_start"() <{level = 10 : i32, message = "bld,bmd->blm"}> : () -> ()
    %cst_79 = arith.constant dense<0.000000e+00> : vector<2x8x8xf32>
    %109 = tpu.matmul %106, %107, %cst_79 {dimension_numbers = #tpu.dot_dimension_numbers<[2], [2], [1], [1], [0, 0, 0, 1, 1, 1], [0], [0]>} : vector<2x8x32xf32>, vector<2x8x32xf32>, vector<2x8x8xf32> -> vector<2x8x8xf32>
    "tpu.trace_stop"() : () -> ()
    %cst_80 = arith.constant dense<0xFF800000> : vector<2x8xf32>
    %110 = vector.multi_reduction <maximumf>, %109, %cst_80 [2] : vector<2x8x8xf32> to vector<2x8xf32>
    %111 = vector.shape_cast %110 : vector<2x8xf32> to vector<2x8x1xf32>
    %112 = vector.broadcast %111 : vector<2x8x1xf32> to vector<2x8x8xf32>
    %113 = arith.subf %109, %112 : vector<2x8x8xf32>
    %114 = math.exp %113 : vector<2x8x8xf32>
    %cst_81 = arith.constant dense<0.000000e+00> : vector<2x8xf32>
    %115 = vector.multi_reduction <add>, %114, %cst_81 [2] : vector<2x8x8xf32> to vector<2x8xf32>
    %116 = vector.shape_cast %115 : vector<2x8xf32> to vector<2x8x1xf32>
    %117 = tpu.reciprocal %116 {approx = true} : vector<2x8x1xf32> -> vector<2x8x1xf32>
    %118 = vector.broadcast %117 : vector<2x8x1xf32> to vector<2x8x8xf32>
    %119 = arith.mulf %114, %118 : vector<2x8x8xf32>
    "tpu.trace_start"() <{level = 10 : i32, message = "blm,bmd->bld"}> : () -> ()
    %cst_82 = arith.constant dense<0.000000e+00> : vector<2x8x32xf32>
    %120 = tpu.matmul %119, %108, %cst_82 {dimension_numbers = #tpu.dot_dimension_numbers<[2], [1], [1], [2], [0, 0, 0, 1, 1, 2], [0], [0]>} : vector<2x8x8xf32>, vector<2x8x32xf32>, vector<2x8x32xf32> -> vector<2x8x32xf32>
    "tpu.trace_stop"() : () -> ()
    %121 = vector.shape_cast %120 : vector<2x8x32xf32> to vector<16x32xf32>
    %c2_83 = arith.constant 2 : index
    %c0_84 = arith.constant 0 : index
    %c0_85 = arith.constant 0 : index
    %122 = vector.load %arg8[%c2_83, %c0_84, %c0_85] : memref<4x32x32xf32, #tpu.memory_space<vmem>>, vector<1x32x32xf32>
    %123 = vector.shape_cast %122 : vector<1x32x32xf32> to vector<32x32xf32>
    %cst_86 = arith.constant dense<0.000000e+00> : vector<16x32xf32>
    %124 = tpu.matmul %121, %123, %cst_86 {dimension_numbers = #tpu.dot_dimension_numbers<[1], [0], [0], [1], [0, 0, 1, 1], [], []>} : vector<16x32xf32>, vector<32x32xf32>, vector<16x32xf32> -> vector<16x32xf32>
    %125 = arith.addf %84, %124 : vector<16x32xf32>
    %c3 = arith.constant 3 : index
    %c0_87 = arith.constant 0 : index
    %c0_88 = arith.constant 0 : index
    %126 = vector.load %arg2[%c3, %c0_87, %c0_88] : memref<4x32x32xf32, #tpu.memory_space<vmem>>, vector<1x32x32xf32>
    %127 = vector.shape_cast %126 : vector<1x32x32xf32> to vector<32x32xf32>
    %cst_89 = arith.constant dense<0.000000e+00> : vector<16x32xf32>
    %128 = tpu.matmul %1, %127, %cst_89 {dimension_numbers = #tpu.dot_dimension_numbers<[1], [0], [0], [1], [0, 0, 1, 1], [], []>} : vector<16x32xf32>, vector<32x32xf32>, vector<16x32xf32> -> vector<16x32xf32>
    %c3_90 = arith.constant 3 : index
    %c0_91 = arith.constant 0 : index
    %c0_92 = arith.constant 0 : index
    %129 = vector.load %arg3[%c3_90, %c0_91, %c0_92] : memref<4x1x32xf32, #tpu.memory_space<vmem>>, vector<1x1x32xf32>
    %130 = vector.shape_cast %129 : vector<1x1x32xf32> to vector<1x32xf32>
    %131 = vector.broadcast %130 : vector<1x32xf32> to vector<16x32xf32>
    %132 = arith.addf %128, %131 : vector<16x32xf32>
    %c3_93 = arith.constant 3 : index
    %c0_94 = arith.constant 0 : index
    %c0_95 = arith.constant 0 : index
    %133 = vector.load %arg4[%c3_93, %c0_94, %c0_95] : memref<4x32x32xf32, #tpu.memory_space<vmem>>, vector<1x32x32xf32>
    %134 = vector.shape_cast %133 : vector<1x32x32xf32> to vector<32x32xf32>
    %cst_96 = arith.constant dense<0.000000e+00> : vector<16x32xf32>
    %135 = tpu.matmul %1, %134, %cst_96 {dimension_numbers = #tpu.dot_dimension_numbers<[1], [0], [0], [1], [0, 0, 1, 1], [], []>} : vector<16x32xf32>, vector<32x32xf32>, vector<16x32xf32> -> vector<16x32xf32>
    %c3_97 = arith.constant 3 : index
    %c0_98 = arith.constant 0 : index
    %c0_99 = arith.constant 0 : index
    %136 = vector.load %arg5[%c3_97, %c0_98, %c0_99] : memref<4x1x32xf32, #tpu.memory_space<vmem>>, vector<1x1x32xf32>
    %137 = vector.shape_cast %136 : vector<1x1x32xf32> to vector<1x32xf32>
    %138 = vector.broadcast %137 : vector<1x32xf32> to vector<16x32xf32>
    %139 = arith.addf %135, %138 : vector<16x32xf32>
    %c3_100 = arith.constant 3 : index
    %c0_101 = arith.constant 0 : index
    %c0_102 = arith.constant 0 : index
    %140 = vector.load %arg6[%c3_100, %c0_101, %c0_102] : memref<4x32x32xf32, #tpu.memory_space<vmem>>, vector<1x32x32xf32>
    %141 = vector.shape_cast %140 : vector<1x32x32xf32> to vector<32x32xf32>
    %cst_103 = arith.constant dense<0.000000e+00> : vector<16x32xf32>
    %142 = tpu.matmul %1, %141, %cst_103 {dimension_numbers = #tpu.dot_dimension_numbers<[1], [0], [0], [1], [0, 0, 1, 1], [], []>} : vector<16x32xf32>, vector<32x32xf32>, vector<16x32xf32> -> vector<16x32xf32>
    %c3_104 = arith.constant 3 : index
    %c0_105 = arith.constant 0 : index
    %c0_106 = arith.constant 0 : index
    %143 = vector.load %arg7[%c3_104, %c0_105, %c0_106] : memref<4x1x32xf32, #tpu.memory_space<vmem>>, vector<1x1x32xf32>
    %144 = vector.shape_cast %143 : vector<1x1x32xf32> to vector<1x32xf32>
    %145 = vector.broadcast %144 : vector<1x32xf32> to vector<16x32xf32>
    %146 = arith.addf %142, %145 : vector<16x32xf32>
    %147 = vector.shape_cast %132 : vector<16x32xf32> to vector<2x8x32xf32>
    %148 = vector.shape_cast %139 : vector<16x32xf32> to vector<2x8x32xf32>
    %149 = vector.shape_cast %146 : vector<16x32xf32> to vector<2x8x32xf32>
    "tpu.trace_start"() <{level = 10 : i32, message = "bld,bmd->blm"}> : () -> ()
    %cst_107 = arith.constant dense<0.000000e+00> : vector<2x8x8xf32>
    %150 = tpu.matmul %147, %148, %cst_107 {dimension_numbers = #tpu.dot_dimension_numbers<[2], [2], [1], [1], [0, 0, 0, 1, 1, 1], [0], [0]>} : vector<2x8x32xf32>, vector<2x8x32xf32>, vector<2x8x8xf32> -> vector<2x8x8xf32>
    "tpu.trace_stop"() : () -> ()
    %cst_108 = arith.constant dense<0xFF800000> : vector<2x8xf32>
    %151 = vector.multi_reduction <maximumf>, %150, %cst_108 [2] : vector<2x8x8xf32> to vector<2x8xf32>
    %152 = vector.shape_cast %151 : vector<2x8xf32> to vector<2x8x1xf32>
    %153 = vector.broadcast %152 : vector<2x8x1xf32> to vector<2x8x8xf32>
    %154 = arith.subf %150, %153 : vector<2x8x8xf32>
    %155 = math.exp %154 : vector<2x8x8xf32>
    %cst_109 = arith.constant dense<0.000000e+00> : vector<2x8xf32>
    %156 = vector.multi_reduction <add>, %155, %cst_109 [2] : vector<2x8x8xf32> to vector<2x8xf32>
    %157 = vector.shape_cast %156 : vector<2x8xf32> to vector<2x8x1xf32>
    %158 = tpu.reciprocal %157 {approx = true} : vector<2x8x1xf32> -> vector<2x8x1xf32>
    %159 = vector.broadcast %158 : vector<2x8x1xf32> to vector<2x8x8xf32>
    %160 = arith.mulf %155, %159 : vector<2x8x8xf32>
    "tpu.trace_start"() <{level = 10 : i32, message = "blm,bmd->bld"}> : () -> ()
    %cst_110 = arith.constant dense<0.000000e+00> : vector<2x8x32xf32>
    %161 = tpu.matmul %160, %149, %cst_110 {dimension_numbers = #tpu.dot_dimension_numbers<[2], [1], [1], [2], [0, 0, 0, 1, 1, 2], [0], [0]>} : vector<2x8x8xf32>, vector<2x8x32xf32>, vector<2x8x32xf32> -> vector<2x8x32xf32>
    "tpu.trace_stop"() : () -> ()
    %162 = vector.shape_cast %161 : vector<2x8x32xf32> to vector<16x32xf32>
    %c3_111 = arith.constant 3 : index
    %c0_112 = arith.constant 0 : index
    %c0_113 = arith.constant 0 : index
    %163 = vector.load %arg8[%c3_111, %c0_112, %c0_113] : memref<4x32x32xf32, #tpu.memory_space<vmem>>, vector<1x32x32xf32>
    %164 = vector.shape_cast %163 : vector<1x32x32xf32> to vector<32x32xf32>
    %cst_114 = arith.constant dense<0.000000e+00> : vector<16x32xf32>
    %165 = tpu.matmul %162, %164, %cst_114 {dimension_numbers = #tpu.dot_dimension_numbers<[1], [0], [0], [1], [0, 0, 1, 1], [], []>} : vector<16x32xf32>, vector<32x32xf32>, vector<16x32xf32> -> vector<16x32xf32>
    %166 = arith.addf %125, %165 : vector<16x32xf32>
    %c0_115 = arith.constant 0 : index
    %c0_116 = arith.constant 0 : index
    %167 = vector.load %arg9[%c0_115, %c0_116] : memref<1x32xf32, #tpu.memory_space<vmem>>, vector<1x32xf32>
    %168 = vector.broadcast %167 : vector<1x32xf32> to vector<16x32xf32>
    %169 = arith.addf %166, %168 : vector<16x32xf32>
    %170 = arith.addf %169, %1 : vector<16x32xf32>
    %cst_117 = arith.constant dense<0.000000e+00> : vector<16xf32>
    %171 = vector.multi_reduction <add>, %170, %cst_117 [1] : vector<16x32xf32> to vector<16xf32>
    %172 = vector.shape_cast %171 : vector<16xf32> to vector<16x1xf32>
    %cst_118 = arith.constant 3.200000e+01 : f32
    %173 = vector.broadcast %cst_118 : f32 to vector<16x1xf32>
    %174 = arith.divf %172, %173 : vector<16x1xf32>
    %175 = vector.broadcast %174 : vector<16x1xf32> to vector<16x32xf32>
    %176 = arith.subf %170, %175 : vector<16x32xf32>
    %177 = arith.mulf %176, %176 : vector<16x32xf32>
    %cst_119 = arith.constant dense<0.000000e+00> : vector<16xf32>
    %178 = vector.multi_reduction <add>, %177, %cst_119 [1] : vector<16x32xf32> to vector<16xf32>
    %179 = vector.shape_cast %178 : vector<16xf32> to vector<16x1xf32>
    %cst_120 = arith.constant 3.200000e+01 : f32
    %180 = vector.broadcast %cst_120 : f32 to vector<16x1xf32>
    %181 = arith.divf %179, %180 : vector<16x1xf32>
    %182 = vector.broadcast %174 : vector<16x1xf32> to vector<16x32xf32>
    %183 = arith.subf %170, %182 : vector<16x32xf32>
    %cst_121 = arith.constant 9.99999974E-6 : f32
    %184 = vector.broadcast %cst_121 : f32 to vector<16x1xf32>
    %185 = arith.addf %181, %184 : vector<16x1xf32>
    %186 = math.rsqrt %185 : vector<16x1xf32>
    %187 = vector.broadcast %186 : vector<16x1xf32> to vector<16x32xf32>
    %188 = arith.mulf %183, %187 : vector<16x32xf32>
    %c0_122 = arith.constant 0 : index
    %c0_123 = arith.constant 0 : index
    %189 = vector.load %arg10[%c0_122, %c0_123] : memref<1x32xf32, #tpu.memory_space<vmem>>, vector<1x32xf32>
    %190 = vector.broadcast %189 : vector<1x32xf32> to vector<16x32xf32>
    %191 = arith.mulf %188, %190 : vector<16x32xf32>
    %c0_124 = arith.constant 0 : index
    %c0_125 = arith.constant 0 : index
    %192 = vector.load %arg11[%c0_124, %c0_125] : memref<1x32xf32, #tpu.memory_space<vmem>>, vector<1x32xf32>
    %193 = vector.broadcast %192 : vector<1x32xf32> to vector<16x32xf32>
    %194 = arith.addf %191, %193 : vector<16x32xf32>
    %195 = vector.shape_cast %194 : vector<16x32xf32> to vector<2x8x32xf32>
    %c0_126 = arith.constant 0 : index
    %c0_127 = arith.constant 0 : index
    %c0_128 = arith.constant 0 : index
    %196 = vector.load %arg12[%c0_126, %c0_127, %c0_128] : memref<2x8x32xf32, #tpu.memory_space<vmem>>, vector<2x8x32xf32>
    tpu.vector_store %arg12[%c0_126, %c0_127, %c0_128], %195 {strides = array<i32>} : memref<2x8x32xf32, #tpu.memory_space<vmem>>, vector<2x8x32xf32>,
    return
  }
  func.func @transform_0(%arg0: i32) -> (i32, i32, i32) {
    %c0_i32 = arith.constant 0 : i32
    %c0_i32_0 = arith.constant 0 : i32
    %c0_i32_1 = arith.constant 0 : i32
    return %arg0, %c0_i32, %c0_i32_0 : i32, i32, i32
  }
  func.func @transform_1(%arg0: i32) -> (i32, i32, i32) {
    %c0_i32 = arith.constant 0 : i32
    %c0_i32_0 = arith.constant 0 : i32
    %c0_i32_1 = arith.constant 0 : i32
    %c0_i32_2 = arith.constant 0 : i32
    return %c0_i32, %c0_i32_0, %c0_i32_1 : i32, i32, i32
  }
  func.func @transform_2(%arg0: i32) -> (i32, i32, i32) {
    %c0_i32 = arith.constant 0 : i32
    %c0_i32_0 = arith.constant 0 : i32
    %c0_i32_1 = arith.constant 0 : i32
    %c0_i32_2 = arith.constant 0 : i32
    return %c0_i32, %c0_i32_0, %c0_i32_1 : i32, i32, i32
  }
  func.func @transform_3(%arg0: i32) -> (i32, i32, i32) {
    %c0_i32 = arith.constant 0 : i32
    %c0_i32_0 = arith.constant 0 : i32
    %c0_i32_1 = arith.constant 0 : i32
    %c0_i32_2 = arith.constant 0 : i32
    return %c0_i32, %c0_i32_0, %c0_i32_1 : i32, i32, i32
  }
  func.func @transform_4(%arg0: i32) -> (i32, i32, i32) {
    %c0_i32 = arith.constant 0 : i32
    %c0_i32_0 = arith.constant 0 : i32
    %c0_i32_1 = arith.constant 0 : i32
    %c0_i32_2 = arith.constant 0 : i32
    return %c0_i32, %c0_i32_0, %c0_i32_1 : i32, i32, i32
  }
  func.func @transform_5(%arg0: i32) -> (i32, i32, i32) {
    %c0_i32 = arith.constant 0 : i32
    %c0_i32_0 = arith.constant 0 : i32
    %c0_i32_1 = arith.constant 0 : i32
    %c0_i32_2 = arith.constant 0 : i32
    return %c0_i32, %c0_i32_0, %c0_i32_1 : i32, i32, i32
  }
  func.func @transform_6(%arg0: i32) -> (i32, i32, i32) {
    %c0_i32 = arith.constant 0 : i32
    %c0_i32_0 = arith.constant 0 : i32
    %c0_i32_1 = arith.constant 0 : i32
    %c0_i32_2 = arith.constant 0 : i32
    return %c0_i32, %c0_i32_0, %c0_i32_1 : i32, i32, i32
  }
  func.func @transform_7(%arg0: i32) -> (i32, i32, i32) {
    %c0_i32 = arith.constant 0 : i32
    %c0_i32_0 = arith.constant 0 : i32
    %c0_i32_1 = arith.constant 0 : i32
    %c0_i32_2 = arith.constant 0 : i32
    return %c0_i32, %c0_i32_0, %c0_i32_1 : i32, i32, i32
  }
  func.func @transform_8(%arg0: i32) -> (i32, i32) {
    %c0_i32 = arith.constant 0 : i32
    %c0_i32_0 = arith.constant 0 : i32
    %c0_i32_1 = arith.constant 0 : i32
    return %c0_i32, %c0_i32_0 : i32, i32
  }
  func.func @transform_9(%arg0: i32) -> (i32, i32) {
    %c0_i32 = arith.constant 0 : i32
    %c0_i32_0 = arith.constant 0 : i32
    %c0_i32_1 = arith.constant 0 : i32
    return %c0_i32, %c0_i32_0 : i32, i32
  }
  func.func @transform_10(%arg0: i32) -> (i32, i32) {
    %c0_i32 = arith.constant 0 : i32
    %c0_i32_0 = arith.constant 0 : i32
    %c0_i32_1 = arith.constant 0 : i32
    return %c0_i32, %c0_i32_0 : i32, i32
  }
  func.func @transform_11(%arg0: i32) -> (i32, i32, i32) {
    %c0_i32 = arith.constant 0 : i32
    %c0_i32_0 = arith.constant 0 : i32
    %c0_i32_1 = arith.constant 0 : i32
    return %arg0, %c0_i32, %c0_i32_0 : i32, i32, i32
  }
}

</mosaic_0001>

<bundles_post_ra>
// kernel: tpu_custom_call.1
= control target key start
LH: loop header
LB: loop body
LE: loop exit
PB: predicated region body
PF: predicated region fallthrough
CT: control target
= control target key end

     0   :  { %16 = vsyncpa [#allocation3], 0  ;;  %s1855_s0 = inlined_call_operand.hbm [shape: f32[2,8,32], index: 0, kind: input, shape index: {}]   ;;  %s1856_s1 = inlined_call_operand.hbm [shape: f32[4,32,32], index: 1, kind: input, shape index: {}]   ;;  %s1857_s2 = inlined_call_operand.hbm [shape: f32[4,1,32], index: 2, kind: input, shape index: {}]   ;;  %s1858_s3 = inlined_call_operand.hbm [shape: f32[4,32,32], index: 3, kind: input, shape index: {}]   ;;  %s1859_s4 = inlined_call_operand.hbm [shape: f32[4,1,32], index: 4, kind: input, shape index: {}]   ;;  %s1860_s5 = inlined_call_operand.hbm [shape: f32[4,32,32], index: 5, kind: input, shape index: {}]   ;;  %s1861_s6 = inlined_call_operand.vmem [shape: f32[4,1,32], index: 6, kind: input, shape index: {}]   ;;  %s1862_s7 = inlined_call_operand.hbm [shape: f32[4,32,32], index: 7, kind: input, shape index: {}]   ;;  %s1863_s8 = inlined_call_operand.vmem [shape: f32[1,32], index: 8, kind: input, shape index: {}]   ;;  %s1864_s9 = inlined_call_operand.vmem [shape: f32[1,32], index: 9, kind: input, shape index: {}]   ;;  %s1865_s10 = inlined_call_operand.vmem [shape: f32[1,32], index: 10, kind: input, shape index: {}]   ;;  %s1866_s11 = inlined_call_operand.hbm [shape: f32[2,8,32], index: 11, kind: output, shape index: {}]  }
   0x1   :  { %17 = vsyncpa [#allocation6], 0 }
   0x2   :  { %18 = vsyncpa [#allocation9], 0 }
   0x3   :  { %19 = vsyncpa [#allocation12], 0 }
   0x4   :  { %20 = vsyncpa [#allocation4], 0  ;;  %s38_s19 = sshll.u32 %s1856_s1, 4  ;;  %s1593_s20 = smov [#allocation5]   ;;  %s39_s19 = int_to_ptr.hbm [resolvable:$true] %s38_s19 }
   0x5   :  { %s40_s21 = sshll.u32 %s1593_s20, 4  ;;  %s64_s24 = sshll.u32 %s1858_s3, 4  ;;  %s41_s21 = int_to_ptr.vmem [resolvable:$true] %s40_s21  ;;  %s65_s24 = int_to_ptr.hbm [resolvable:$true] %s64_s24 }
   0x6   :  { %s1594_s25 = smov 128   ;;  %s1595_s26 = smov 8  }
   0x7   :  { %46 = dma.hbm_to_vmem [thread:$0]  %s39_s19, 2048, %s41_s21, [#allocation6], %s1594_s25, %s1594_s25, %s1595_s26  }
   0x8   :  { %s1596_s27 = smov [#allocation8]   ;;  %s90_s1 = sshll.u32 %s1860_s5, 4  ;;  %s91_s1 = int_to_ptr.hbm [resolvable:$true] %s90_s1 }
   0x9   :  { %s66_s28 = sshll.u32 %s1596_s27, 4  ;;  %s25_s13 = sshll.u32 %s1855_s0, 4  ;;  %s67_s28 = int_to_ptr.vmem [resolvable:$true] %s66_s28  ;;  %s26_s13 = int_to_ptr.hbm [resolvable:$true] %s25_s13 }
   0xa   :  { %72 = dma.hbm_to_vmem [thread:$0]  %s65_s24, 2048, %s67_s28, [#allocation9], %s1594_s25, %s1594_s25, %s1595_s26  }
   0xb   :  { %s1597_s14 = smov [#allocation11]   ;;  %s1598_s16 = smov [#allocation2]  }
   0xc   :  { %s92_s15 = sshll.u32 %s1597_s14, 4  ;;  %s27_s5 = sshll.u32 %s1598_s16, 4  ;;  %s93_s15 = int_to_ptr.vmem [resolvable:$true] %s92_s15  ;;  %s28_s5 = int_to_ptr.vmem [resolvable:$true] %s27_s5 }
   0xd   :  { %98 = dma.hbm_to_vmem [thread:$0]  %s91_s1, 2048, %s93_s15, [#allocation12], %s1594_s25, %s1594_s25, %s1595_s26  }
   0xe   :  { %s51_s19 = sshll.u32 %s1857_s2, 4  ;;  %s1599_s0 = smov [#allocation7]   ;;  %s52_s19 = int_to_ptr.hbm [resolvable:$true] %s51_s19 }
   0xf   :  { %33 = dma.hbm_to_vmem [thread:$0]  %s26_s13, 256, %s28_s5, [#allocation3], %s1594_s25, %s1594_s25, %s1595_s26  }
  0x10   :  { %s53_s20 = sshll.u32 %s1599_s0, 4  ;;  %s77_s23 = sshll.u32 %s1859_s4, 4  ;;  %s54_s20 = int_to_ptr.vmem [resolvable:$true] %s53_s20  ;;  %s78_s23 = int_to_ptr.hbm [resolvable:$true] %s77_s23 }
  0x11   :  { %s1600_s24 = smov 16   ;;  %s1601_s27 = smov 1  }
  0x12   :  { %59 = dma.hbm_to_vmem [thread:$0]  %s52_s19, 64, %s54_s20, [#allocation6], %s1600_s24, %s1600_s24, %s1601_s27  }
  0x13   :  { %s1602_s28 = smov [#allocation10]   ;;  %s105_s1 = sshll.u32 %s1862_s7, 4  ;;  %s106_s1 = int_to_ptr.hbm [resolvable:$true] %s105_s1 }
  0x14   :  { %s79_s29 = sshll.u32 %s1602_s28, 4  ;;  %s1603_s3 = smov [#allocation13]   ;;  %s80_s29 = int_to_ptr.vmem [resolvable:$true] %s79_s29 }
  0x15   :  { %85 = dma.hbm_to_vmem [thread:$0]  %s78_s23, 64, %s80_s29, [#allocation9], %s1600_s24, %s1600_s24, %s1601_s27  }
  0x16   :  { %s107_s12 = sshll.u32 %s1603_s3, 4  ;;  %s108_s12 = int_to_ptr.vmem [resolvable:$true] %s107_s12 }
  0x17   :  { %113 = dma.hbm_to_vmem [thread:$0]  %s106_s1, 2048, %s108_s12, [#allocation12], %s1594_s25, %s1594_s25, %s1595_s26  }
  0x18   :  { %1583 = dma.done.wait [#allocation3], 256  }
  0x19   :  { %1584 = vsyncadd [#allocation3], 4294967040 }
  0x1a   :  { %1585 = dma.done.wait [#allocation6], 2112  }
  0x1b   :  { %1586 = vsyncadd [#allocation6], 4294965184 }
  0x1c   :  { %1587 = dma.done.wait [#allocation9], 2112  }
  0x1d   :  { %1588 = vsyncadd [#allocation9], 4294965184 }
  0x1e   :  { %1589 = dma.done.wait [#allocation12], 4096  }
  0x1f   :  { %1590 = vsyncadd [#allocation12], 4294963200  ;;  %v191_v0 = vld [vmem:[#allocation8 + $0x18] sm:$0xff]  ;;  %v190_v1 = vld [vmem:[#allocation8 + $0x10] sm:$0xff]  ;;  %vm158_vm0 = vcmask 261120   ;;  %vm302_vm1 = vcmask 64512  }
  0x20   :  { %v153_v2 = vld [vmem:[#allocation5 + $0x18] sm:$0xff]  ;;  %208 = vmatpush.msra.mxu1 %v191_v0  ;;  %1321 = vmatpush.msra.mxu2 %v191_v0  ;;  %v152_v3 = vld [vmem:[#allocation5 + $0x10] sm:$0xff]  ;;  %v188_v5 = vld [vmem:[#allocation8] sm:$0xff]  ;;  %s1246_s24 = sshll.u32 %s1866_s11, 4  ;;  %s1247_s24 = int_to_ptr.hbm [resolvable:$true] %s1246_s24 }
  0x21   :  { %177 = vmatpush.msra.mxu0 %v153_v2  ;;  %v189_v4 = vld [vmem:[#allocation8 + $0x8] sm:$0xff]  ;;  %v150_v8 = vld [vmem:[#allocation5] sm:$0xff]  ;;  %v1704_v9 = vld [vmem:[#allocation2 + $0x8] sm:$0xff] }
  0x22   :  { %v151_v6 = vld [vmem:[#allocation5 + $0x8] sm:$0xff]  ;;  %209 = vmatpush.msra.mxu1 %v190_v1  ;;  %1322 = vmatpush.msra.mxu2 %v190_v1  ;;  %v1702_v7 = vld [vmem:[#allocation2] sm:$0xff]  ;;  %v1338_v10 = vld [vmem:[#allocation10] ss:$0 sm:$0xff] }
  0x23   :  { %178 = vmatpush.msra.mxu0 %v152_v3  ;;  %v1339_v11 = vld [vmem:[#allocation7] ss:$0 sm:$0xff]  ;;  %v221_v21 = vld [vmem:[#allocation11 + $0x10] sm:$0xff]  ;;  %v220_v22 = vld [vmem:[#allocation11 + $0x8] sm:$0xff] }
  0x24   :  { %210 = vmatpush.msra.mxu1 %v189_v4  ;;  %1323 = vmatpush.msra.mxu2 %v189_v4  ;;  %v222_v20 = vld [vmem:[#allocation11 + $0x18] sm:$0xff]  ;;  %v219_v23 = vld [vmem:[#allocation11] sm:$0xff]  ;;  %v411_v29 = vld [vmem:[#allocation8 + $0x30] sm:$0xff] }
  0x25   :  { %179 = vmatpush.msra.mxu0 %v151_v6  ;;  %v412_v28 = vld [vmem:[#allocation8 + $0x38] sm:$0xff]  ;;  %v410_v30 = vld [vmem:[#allocation8 + $0x28] sm:$0xff]  ;;  %v409_v31 = vld [vmem:[#allocation8 + $0x20] sm:$0xff] }
  0x26   :  { %211 = vmatpush.msra.mxu1 %v188_v5  ;;  %1324 = vmatpush.msra.mxu2 %v188_v5  ;;  %v379_v32 = vld [vmem:[#allocation5 + $0x38] sm:$0xff]  ;;  %v378_v33 = vld [vmem:[#allocation5 + $0x30] sm:$0xff]  ;;  %v377_v34 = vld [vmem:[#allocation5 + $0x28] sm:$0xff] }
  0x27   :  { %1264 = vmatmul.msk.f32.vlgmr.msra.gmra.mxu1 %vm158_vm0, %v1702_v7  ;;  %180 = vmatpush.msra.mxu0 %v150_v8  ;;  %v376_v35 = vld [vmem:[#allocation5 + $0x20] sm:$0xff]  ;;  %v1340_v46 = vld [vmem:[%s1861_s6] ss:$0 sm:$0xff]  ;;  %v373_v2 = vld [vmem:[#allocation13 + $0x10] sm:$0xff] }
  0x28   :  { %1265 = vmatmul.msk.f32.vlgmr.msra.gmra.mxu2 %vm158_vm0, %v1704_v9  ;;  %1262 = vmatmul.msk.f32.vlgmr.msra.gmra.mxu0 %vm158_vm0, %v1702_v7  ;;  %v1341_v51 = vld [vmem:[#allocation10 + $0x1] ss:$0 sm:$0xff]  ;;  %v1342_v63 = vld [vmem:[#allocation7 + $0x1] ss:$0 sm:$0xff]  ;;  %v372_v4 = vld [vmem:[#allocation13 + $0x8] sm:$0xff] }
  0x29   :  { %239 = vmatpush.msrb.mxu2 %v222_v20  ;;  %397 = vmatpush.msrb.mxu1 %v379_v32  ;;  %v374_v1 = vld [vmem:[#allocation13 + $0x18] sm:$0xff]  ;;  %v371_v6 = vld [vmem:[#allocation13] sm:$0xff] }
  0x2a   :  { %v445_v8 = vld [vmem:[#allocation11 + $0x38] sm:$0xff] }
  0x2b   :  { %240 = vmatpush.msrb.mxu2 %v221_v21  ;;  %398 = vmatpush.msrb.mxu1 %v378_v33 }
  0x2d   :  { %241 = vmatpush.msrb.mxu2 %v220_v22  ;;  %399 = vmatpush.msrb.mxu1 %v377_v34  ;;  %v694_v34 = vld [vmem:[#allocation8 + $0x58] sm:$0xff] }
  0x2f   :  { %242 = vmatpush.msrb.mxu2 %v219_v23  ;;  %400 = vmatpush.msrb.mxu1 %v376_v35  ;;  %v693_v35 = vld [vmem:[#allocation8 + $0x50] sm:$0xff] }
  0x30   :  { %1263 = vmatmul.msk.f32.gmra.mxu0 %vm158_vm0, %v1704_v9  ;;  %1266 = vmatmul.msk.f32.vlgmr.msrb.gmra.mxu2 %vm158_vm0, %v1702_v7 }
  0x31   :  { %430 = vmatpush.msra.mxu2 %v412_v28  ;;  %1274 = vmatmul.msk.f32.vlgmr.msrb.gmra.mxu1 %vm158_vm0, %v1702_v7 }
  0x33   :  { %431 = vmatpush.msra.mxu2 %v411_v29  ;;  %v1343_v29 = vld [vmem:[%s1861_s6 + $0x1] ss:$0 sm:$0xff] }
  0x35   :  { %432 = vmatpush.msra.mxu2 %v410_v30 }
  0x37   :  { %433 = vmatpush.msra.mxu2 %v409_v31 }
  0x38   :  { %1267 = vmatmul.msk.f32.gmra.mxu2 %vm158_vm0, %v1704_v9 }
  0x39   :  { %1275 = vmatmul.msk.f32.gmra.mxu1 %vm158_vm0, %v1704_v9 }
  0x40   :  { %1276 = vmatmul.msk.f32.vlgmr.msra.gmra.mxu2 %vm158_vm0, %v1702_v7 }
  0x48   :  { %1277 = vmatmul.msk.f32.gmra.mxu2 %vm158_vm0, %v1704_v9 }
  0xa4   :  { %v213_v12 = vpop.f32.mrf.mxu1 }
  0xa5   :  { %v214_v13 = vadd.f32 %v1338_v10, %v213_v12  ;;  %v182_v14 = vpop.f32.mrf.mxu0 }
  0xa6   :  { %v183_v15 = vadd.f32 %v1339_v11, %v182_v14 }
  0xa7   :  { %1268 = vmatpush.xpose.msk.msra.mxu3 %vm158_vm0, %v214_v13 }
  0xaa   :  { %1269 = vmatmul.msk.f32.vlgmr.msra.gmra.mxu3 %vm158_vm0, %v183_v15 }
  0xab   :  { %v216_v16 = vpop.f32.mrf.mxu2 }
  0xac   :  { %v217_v17 = vadd.f32 %v1338_v10, %v216_v16  ;;  %v444_v10 = vld [vmem:[#allocation11 + $0x30] sm:$0xff] }
  0xad   :  { %v185_v18 = vpop.f32.mrf.mxu0 }
  0xae   :  { %v186_v19 = vadd.f32 %v1339_v11, %v185_v18  ;;  %1270 = vmatpush.xpose.msk.msrb.mxu3 %vm158_vm0, %v217_v17  ;;  %v402_v62 = vpop.f32.mrf.mxu1  ;;  %v443_v11 = vld [vmem:[#allocation11 + $0x28] sm:$0xff]  ;;  %v442_v18 = vld [vmem:[#allocation11 + $0x20] sm:$0xff] }
  0xaf   :  { %v403_v0 = vadd.f32 %v1342_v63, %v402_v62 }
  0xb2   :  { %1271 = vmatmul.msk.f32.vlgmr.msrb.gmra.mxu3 %vm158_vm0, %v186_v19 }
  0xb3   :  { %v244_v47 = vpop.f32.mrf.mxu2 }
  0xb4   :  { %v245_v48 = vadd.f32 %v1340_v46, %v244_v47 }
  0xb6   :  { %343 = vmatpush.msra.mxu3 %v245_v48  ;;  %v405_v3 = vpop.f32.mrf.mxu1 }
  0xb7   :  { %v406_v5 = vadd.f32 %v1342_v63, %v405_v3 }
  0xb8   :  { %463 = vmatpush.msrb.mxu3 %v445_v8 }
  0xba   :  { %464 = vmatpush.msrb.mxu3 %v444_v10 }
  0xbb   :  { %v247_v49 = vpop.f32.mrf.mxu2 }
  0xbc   :  { %v248_v50 = vadd.f32 %v1340_v46, %v247_v49  ;;  %465 = vmatpush.msrb.mxu3 %v443_v11 }
  0xbe   :  { %366 = vmatpush.msrb.mxu0 %v248_v50  ;;  %466 = vmatpush.msrb.mxu3 %v442_v18  ;;  %v596_v50 = vld [vmem:[#allocation13 + $0x28] sm:$0xff] }
  0xc3   :  { %v435_v52 = vpop.f32.mrf.mxu2 }
  0xc4   :  { %v436_v53 = vadd.f32 %v1341_v51, %v435_v52 }
  0xc6   :  { %1281 = vmatpush.xpose.msk.msra.mxu0 %vm158_vm0, %v436_v53 }
  0xcb   :  { %v438_v58 = vpop.f32.mrf.mxu2 }
  0xcc   :  { %v439_v60 = vadd.f32 %v1341_v51, %v438_v58  ;;  %v595_v51 = vld [vmem:[#allocation13 + $0x20] sm:$0xff] }
 0x12d   :  { %v273_v24 = vpop.f32.mrf.mxu3 }
 0x12e   :  { %v303_v25 = vsel %vm302_vm1, %v273_v24, -inf }
 0x12f   :  { %304 = vmax.xlane.f32.xlu1 %v303_v25 }
 0x135   :  { %v299_v26 = vpop.f32.mrf.mxu3 }
 0x136   :  { %v306_v27 = vsel %vm302_vm1, %v299_v26, -inf }
 0x137   :  { %307 = vmax.xlane.f32.xlu0 %v306_v27 }
 0x1a2   :  { %v305_v36 = vpop.xlane.xlu1 %304 }
 0x1a3   :  { %v309_v37 = vsub.f32 %v273_v24, %v305_v36  ;;  %v692_v36 = vld [vmem:[#allocation8 + $0x48] sm:$0xff] }
 0x1a5   :  { %v311_v38 = vmul.f32 1.442695, %v309_v37  ;;  %v691_v37 = vld [vmem:[#allocation8 + $0x40] sm:$0xff] }
 0x1a7   :  { %1353 = vpow2.f32 %v311_v38  ;;  %v661_v38 = vld [vmem:[#allocation5 + $0x58] sm:$0xff] }
 0x1aa   :  { %v308_v39 = vpop.xlane.xlu0 %307 }
 0x1ab   :  { %v310_v40 = vsub.f32 %v299_v26, %v308_v39  ;;  %v660_v39 = vld [vmem:[#allocation5 + $0x50] sm:$0xff] }
 0x1ad   :  { %v1354_v41 = vpop.eup %1353  ;;  %v313_v42 = vmul.f32 1.442695, %v310_v40  ;;  %v659_v40 = vld [vmem:[#allocation5 + $0x48] sm:$0xff] }
 0x1ae   :  { %v315_v43 = vsel %vm302_vm1, %v1354_v41, 0.0 }
 0x1af   :  { %1355 = vpow2.f32 %v313_v42  ;;  %316 = vadd.xlane.f32.xlu1 %v315_v43  ;;  %v598_v43 = vld [vmem:[#allocation13 + $0x38] sm:$0xff] }
 0x1b5   :  { %v1356_v44 = vpop.eup %1355 }
 0x1b6   :  { %v318_v45 = vsel %vm302_vm1, %v1356_v44, 0.0 }
 0x1b7   :  { %319 = vadd.xlane.f32.xlu0 %v318_v45 }
 0x222   :  { %v317_v54 = vpop.xlane.xlu1 %316 }
 0x223   :  { %1357 = vrcp.f32 %v317_v54  ;;  %v1344_v54 = vld [vmem:[#allocation10 + $0x2] ss:$0 sm:$0xff] }
 0x229   :  { %v1358_v55 = vpop.eup %1357 }
 0x22a   :  { %v323_v56 = vmul.f32 %v1358_v55, %v1354_v41  ;;  %v320_v57 = vpop.xlane.xlu0 %319  ;;  %v658_v41 = vld [vmem:[#allocation5 + $0x40] sm:$0xff] }
 0x22b   :  { %1359 = vrcp.f32 %v320_v57  ;;  %v1345_v55 = vld [vmem:[#allocation7 + $0x2] ss:$0 sm:$0xff] }
 0x22c   :  { %1272 = vmatmul.msk.f32.vlgmr.msra.gmra.mxu3 %vm302_vm1, %v323_v56 }
 0x22d   :  { %617 = vmatpush.msra.mxu3 %v598_v43 }
 0x231   :  { %v1360_v59 = vpop.eup %1359 }
 0x232   :  { %v324_v61 = vmul.f32 %v1360_v59, %v1356_v44  ;;  %v597_v44 = vld [vmem:[#allocation13 + $0x30] sm:$0xff] }
 0x233   :  { %618 = vmatpush.msra.mxu3 %v597_v44 }
 0x234   :  { %1273 = vmatmul.msk.f32.vlgmr.msrb.gmra.mxu0 %vm302_vm1, %v324_v61  ;;  %1279 = vmatmul.msk.f32.vlgmr.msrb.gmra.mxu3 %vm158_vm0, %v1702_v7 }
 0x235   :  { %1283 = vmatpush.xpose.msk.msrb.mxu0 %vm158_vm0, %v439_v60  ;;  %619 = vmatpush.msra.mxu3 %v596_v50 }
 0x237   :  { %620 = vmatpush.msra.mxu3 %v595_v51 }
 0x23c   :  { %1282 = vmatmul.msk.f32.vlgmr.msra.gmra.mxu0 %vm158_vm0, %v403_v0  ;;  %1280 = vmatmul.msk.f32.gmra.mxu3 %vm158_vm0, %v1704_v9  ;;  %v727_v0 = vld [vmem:[#allocation11 + $0x58] sm:$0xff] }
 0x23d   :  { %646 = vmatpush.msra.mxu0 %v374_v1  ;;  %v726_v1 = vld [vmem:[#allocation11 + $0x50] sm:$0xff]  ;;  %745 = vmatpush.msrb.mxu3 %v727_v0 }
 0x23f   :  { %647 = vmatpush.msra.mxu0 %v373_v2  ;;  %v725_v2 = vld [vmem:[#allocation11 + $0x48] sm:$0xff]  ;;  %746 = vmatpush.msrb.mxu3 %v726_v1 }
 0x241   :  { %648 = vmatpush.msra.mxu0 %v372_v4  ;;  %v724_v4 = vld [vmem:[#allocation11 + $0x40] sm:$0xff]  ;;  %747 = vmatpush.msrb.mxu3 %v725_v2 }
 0x243   :  { %649 = vmatpush.msra.mxu0 %v371_v6  ;;  %748 = vmatpush.msrb.mxu3 %v724_v4 }
 0x244   :  { %1284 = vmatmul.msk.f32.vlgmr.msrb.gmra.mxu0 %vm158_vm0, %v406_v5 }
 0x2af   :  { %v345_v12 = vpop.f32.mrf.mxu3 }
 0x2b0   :  { %1289 = vmatmul.msk.f32.vlgmr.msra.gmra.mxu0 %vm158_vm0, %v345_v12 }
 0x2b1   :  { %v368_v13 = vpop.f32.mrf.mxu0 }
 0x2b7   :  { %v468_v30 = vpop.f32.mrf.mxu3 }
 0x2b8   :  { %1290 = vmatmul.msk.f32.gmra.mxu0 %vm158_vm0, %v368_v13  ;;  %v469_v31 = vadd.f32 %v1343_v29, %v468_v30  ;;  %v947_v30 = vld [vmem:[#allocation8 + $0x68] sm:$0xff] }
 0x2b9   :  { %v497_v14 = vpop.f32.mrf.mxu0 }
 0x2ba   :  { %v526_v17 = vsel %vm302_vm1, %v497_v14, -inf  ;;  %566 = vmatpush.msra.mxu1 %v469_v31  ;;  %v915_v31 = vld [vmem:[#allocation5 + $0x70] sm:$0xff] }
 0x2bc   :  { %679 = vmatpush.msrb.mxu1 %v661_v38  ;;  %v879_v38 = vld [vmem:[#allocation13 + $0x50] sm:$0xff] }
 0x2be   :  { %680 = vmatpush.msrb.mxu1 %v660_v39  ;;  %v878_v39 = vld [vmem:[#allocation13 + $0x48] sm:$0xff] }
 0x2bf   :  { %v471_v32 = vpop.f32.mrf.mxu3 }
 0x2c0   :  { %v472_v33 = vadd.f32 %v1343_v29, %v471_v32  ;;  %681 = vmatpush.msrb.mxu1 %v659_v40  ;;  %v916_v29 = vld [vmem:[#allocation5 + $0x78] sm:$0xff]  ;;  %v946_v32 = vld [vmem:[#allocation8 + $0x60] sm:$0xff] }
 0x2c1   :  { %v523_v15 = vpop.f32.mrf.mxu0 }
 0x2c2   :  { %v529_v16 = vsel %vm302_vm1, %v523_v15, -inf  ;;  %589 = vmatpush.msrb.mxu2 %v472_v33  ;;  %682 = vmatpush.msrb.mxu1 %v658_v41 }
 0x2c3   :  { %530 = vmax.xlane.f32.xlu2 %v529_v16 }
 0x2c4   :  { %712 = vmatpush.msra.mxu2 %v694_v34  ;;  %v914_v34 = vld [vmem:[#allocation5 + $0x68] sm:$0xff] }
 0x2c6   :  { %713 = vmatpush.msra.mxu2 %v693_v35 }
 0x2c8   :  { %714 = vmatpush.msra.mxu2 %v692_v36  ;;  %v913_v36 = vld [vmem:[#allocation5 + $0x60] sm:$0xff] }
 0x2ca   :  { %715 = vmatpush.msra.mxu2 %v691_v37  ;;  %v880_v37 = vld [vmem:[#allocation13 + $0x58] sm:$0xff] }
 0x2cb   :  { %527 = vmax.xlane.f32.xlu2 %v526_v17 }
 0x32d   :  { %v1772_v3 = vpop.f32.mrf.mxu0 }
 0x335   :  { %v1776_v5 = vpop.f32.mrf.mxu0 }
 0x336   :  { %v531_v19 = vpop.xlane.xlu2 %530 }
 0x337   :  { %v533_v20 = vsub.f32 %v523_v15, %v531_v19 }
 0x339   :  { %v536_v21 = vmul.f32 1.442695, %v533_v20 }
 0x33b   :  { %1361 = vpow2.f32 %v536_v21 }
 0x33e   :  { %v528_v22 = vpop.xlane.xlu2 %527 }
 0x33f   :  { %v532_v23 = vsub.f32 %v497_v14, %v528_v22 }
 0x341   :  { %v1362_v24 = vpop.eup %1361  ;;  %v534_v25 = vmul.f32 1.442695, %v532_v23 }
 0x342   :  { %v541_v26 = vsel %vm302_vm1, %v1362_v24, 0.0 }
 0x343   :  { %1363 = vpow2.f32 %v534_v25  ;;  %542 = vadd.xlane.f32.xlu0 %v541_v26 }
 0x349   :  { %v1364_v27 = vpop.eup %1363 }
 0x34a   :  { %v538_v28 = vsel %vm302_vm1, %v1364_v27, 0.0 }
 0x34b   :  { %539 = vadd.xlane.f32.xlu1 %v538_v28  ;;  %v948_v28 = vld [vmem:[#allocation8 + $0x70] sm:$0xff] }
 0x3b6   :  { %v543_v42 = vpop.xlane.xlu0 %542 }
 0x3b7   :  { %1365 = vrcp.f32 %v543_v42 }
 0x3bd   :  { %v1366_v45 = vpop.eup %1365 }
 0x3be   :  { %v547_v46 = vmul.f32 %v1366_v45, %v1362_v24  ;;  %v540_v47 = vpop.xlane.xlu1 %539  ;;  %v1346_v24 = vld [vmem:[%s1861_s6 + $0x2] ss:$0 sm:$0xff] }
 0x3bf   :  { %1367 = vrcp.f32 %v540_v47  ;;  %v1347_v47 = vld [vmem:[#allocation10 + $0x3] ss:$0 sm:$0xff] }
 0x3c0   :  { %1286 = vmatmul.msk.f32.vlgmr.msrb.gmra.mxu2 %vm302_vm1, %v547_v46  ;;  %v877_v46 = vld [vmem:[#allocation13 + $0x40] sm:$0xff] }
 0x3c5   :  { %v1368_v48 = vpop.eup %1367 }
 0x3c6   :  { %v546_v49 = vmul.f32 %v1368_v48, %v1364_v27  ;;  %v949_v27 = vld [vmem:[#allocation8 + $0x78] sm:$0xff] }
 0x3c8   :  { %1285 = vmatmul.msk.f32.vlgmr.msra.gmra.mxu1 %vm302_vm1, %v546_v49  ;;  %1293 = vmatmul.msk.f32.vlgmr.msra.gmra.mxu2 %vm158_vm0, %v1702_v7 }
 0x3d0   :  { %1294 = vmatmul.msk.f32.gmra.mxu2 %vm158_vm0, %v1704_v9  ;;  %1291 = vmatmul.msk.f32.vlgmr.msrb.gmra.mxu1 %vm158_vm0, %v1702_v7 }
 0x3d8   :  { %1292 = vmatmul.msk.f32.gmra.mxu1 %vm158_vm0, %v1704_v9 }
 0x443   :  { %v591_v52 = vpop.f32.mrf.mxu2 }
 0x445   :  { %v568_v53 = vpop.f32.mrf.mxu1 }
 0x446   :  { %1287 = vmatmul.msk.f32.vlgmr.msra.gmra.mxu3 %vm158_vm0, %v568_v53 }
 0x447   :  { %967 = vmatpush.msra.mxu3 %v949_v27  ;;  %v1134_v27 = vld [vmem:[#allocation13 + $0x70] sm:$0xff] }
 0x449   :  { %968 = vmatpush.msra.mxu3 %v948_v28  ;;  %v1133_v28 = vld [vmem:[#allocation13 + $0x68] sm:$0xff] }
 0x44b   :  { %v717_v56 = vpop.f32.mrf.mxu2  ;;  %969 = vmatpush.msra.mxu3 %v947_v30 }
 0x44c   :  { %v718_v57 = vadd.f32 %v1344_v54, %v717_v56 }
 0x44d   :  { %v684_v58 = vpop.f32.mrf.mxu1  ;;  %970 = vmatpush.msra.mxu3 %v946_v32 }
 0x44e   :  { %1288 = vmatmul.msk.f32.gmra.mxu3 %vm158_vm0, %v591_v52  ;;  %v685_v59 = vadd.f32 %v1345_v55, %v684_v58  ;;  %1298 = vmatpush.xpose.msk.msrb.mxu0 %vm158_vm0, %v718_v57 }
 0x451   :  { %1299 = vmatmul.msk.f32.vlgmr.msrb.gmra.mxu0 %vm158_vm0, %v685_v59  ;;  %v982_v59 = vld [vmem:[#allocation11 + $0x78] sm:$0xff] }
 0x453   :  { %v720_v60 = vpop.f32.mrf.mxu2 }
 0x454   :  { %v721_v61 = vadd.f32 %v1344_v54, %v720_v60 }
 0x455   :  { %v687_v62 = vpop.f32.mrf.mxu1 }
 0x456   :  { %v688_v63 = vadd.f32 %v1345_v55, %v687_v62  ;;  %1300 = vmatpush.xpose.msk.msra.mxu1 %vm158_vm0, %v721_v61  ;;  %1296 = vmatmul.msk.f32.vlgmr.msrb.gmra.mxu3 %vm158_vm0, %v1702_v7  ;;  %v1348_v55 = vld [vmem:[#allocation7 + $0x3] ss:$0 sm:$0xff] }
 0x459   :  { %1301 = vmatmul.msk.f32.vlgmr.msra.gmra.mxu1 %vm158_vm0, %v688_v63 }
 0x45a   :  { %899 = vmatpush.msrb.mxu1 %v880_v37 }
 0x45c   :  { %900 = vmatpush.msrb.mxu1 %v879_v38  ;;  %v1350_v38 = vld [vmem:[%s1863_s8] ss:$0 sm:$0xff] }
 0x45e   :  { %1297 = vmatmul.msk.f32.gmra.mxu3 %vm158_vm0, %v1704_v9  ;;  %901 = vmatpush.msrb.mxu1 %v878_v39 }
 0x460   :  { %902 = vmatpush.msrb.mxu1 %v877_v46 }
 0x466   :  { %1308 = vmatmul.msk.f32.vlgmr.msra.gmra.mxu3 %vm158_vm0, %v1702_v7 }
 0x46e   :  { %1309 = vmatmul.msk.f32.gmra.mxu3 %vm158_vm0, %v1704_v9 }
 0x4c9   :  { %v1784_v22 = vpop.f32.mrf.mxu3 }
 0x4ca   :  { %v652_v60 = vadd.f32 %v1772_v3, %v1784_v22  ;;  %v980_v3 = vld [vmem:[#allocation11 + $0x68] sm:$0xff] }
 0x4ce   :  { %v779_v6 = vpop.f32.mrf.mxu0 }
 0x4cf   :  { %v808_v8 = vsel %vm302_vm1, %v779_v6, -inf }
 0x4d0   :  { %809 = vmax.xlane.f32.xlu2 %v808_v8 }
 0x4d1   :  { %v1786_v23 = vpop.f32.mrf.mxu3 }
 0x4d2   :  { %v655_v63 = vadd.f32 %v1776_v5, %v1786_v23 }
 0x4d6   :  { %v805_v10 = vpop.f32.mrf.mxu1 }
 0x4d7   :  { %v811_v11 = vsel %vm302_vm1, %v805_v10, -inf }
 0x4d8   :  { %812 = vmax.xlane.f32.xlu0 %v811_v11  ;;  %v979_v11 = vld [vmem:[#allocation11 + $0x60] sm:$0xff] }
 0x4d9   :  { %v750_v25 = vpop.f32.mrf.mxu3 }
 0x4da   :  { %v751_v26 = vadd.f32 %v1346_v24, %v750_v25 }
 0x4dc   :  { %848 = vmatpush.msrb.mxu2 %v751_v26  ;;  %v1135_v26 = vld [vmem:[#allocation13 + $0x78] sm:$0xff] }
 0x4de   :  { %934 = vmatpush.msra.mxu2 %v916_v29 }
 0x4e0   :  { %935 = vmatpush.msra.mxu2 %v915_v31 }
 0x4e1   :  { %v753_v33 = vpop.f32.mrf.mxu3 }
 0x4e2   :  { %v754_v35 = vadd.f32 %v1346_v24, %v753_v33  ;;  %936 = vmatpush.msra.mxu2 %v914_v34 }
 0x4e4   :  { %871 = vmatpush.msra.mxu0 %v754_v35  ;;  %937 = vmatpush.msra.mxu2 %v913_v36  ;;  %v1132_v35 = vld [vmem:[#allocation13 + $0x60] sm:$0xff] }
 0x4e6   :  { %1000 = vmatpush.msrb.mxu0 %v982_v59 }
 0x4e9   :  { %v972_v48 = vpop.f32.mrf.mxu3 }
 0x4ea   :  { %v973_v49 = vadd.f32 %v1347_v47, %v972_v48 }
 0x4ec   :  { %1313 = vmatpush.xpose.msk.msra.mxu1 %vm158_vm0, %v973_v49  ;;  %v1604_v49 = vmov 32.0  }
 0x4f1   :  { %v975_v50 = vpop.f32.mrf.mxu3 }
 0x4f2   :  { %v976_v51 = vadd.f32 %v1347_v47, %v975_v50 }
 0x543   :  { %v810_v12 = vpop.xlane.xlu2 %809 }
 0x544   :  { %v814_v13 = vsub.f32 %v779_v6, %v810_v12 }
 0x546   :  { %v816_v14 = vmul.f32 1.442695, %v814_v13 }
 0x548   :  { %1369 = vpow2.f32 %v816_v14 }
 0x54b   :  { %v813_v15 = vpop.xlane.xlu0 %812 }
 0x54c   :  { %v815_v16 = vsub.f32 %v805_v10, %v813_v15  ;;  %v981_v10 = vld [vmem:[#allocation11 + $0x70] sm:$0xff] }
 0x54d   :  { %1001 = vmatpush.msrb.mxu0 %v981_v10 }
 0x54e   :  { %v1370_v17 = vpop.eup %1369  ;;  %v818_v18 = vmul.f32 1.442695, %v815_v16 }
 0x54f   :  { %v820_v19 = vsel %vm302_vm1, %v1370_v17, 0.0  ;;  %1002 = vmatpush.msrb.mxu0 %v980_v3 }
 0x550   :  { %1371 = vpow2.f32 %v818_v18  ;;  %821 = vadd.xlane.f32.xlu1 %v820_v19 }
 0x551   :  { %1003 = vmatpush.msrb.mxu0 %v979_v11 }
 0x556   :  { %v1372_v20 = vpop.eup %1371 }
 0x557   :  { %v823_v21 = vsel %vm302_vm1, %v1372_v20, 0.0 }
 0x558   :  { %824 = vadd.xlane.f32.xlu2 %v823_v21  ;;  %v1349_v21 = vld [vmem:[%s1861_s6 + $0x3] ss:$0 sm:$0xff] }
 0x5c3   :  { %v822_v40 = vpop.xlane.xlu1 %821 }
 0x5c4   :  { %1373 = vrcp.f32 %v822_v40 }
 0x5ca   :  { %v1374_v41 = vpop.eup %1373 }
 0x5cb   :  { %v828_v42 = vmul.f32 %v1374_v41, %v1370_v17  ;;  %v825_v43 = vpop.xlane.xlu2 %824 }
 0x5cc   :  { %1375 = vrcp.f32 %v825_v43 }
 0x5cd   :  { %1302 = vmatmul.msk.f32.vlgmr.msrb.gmra.mxu2 %vm302_vm1, %v828_v42 }
 0x5ce   :  { %1315 = vmatpush.xpose.msk.msrb.mxu2 %vm158_vm0, %v976_v51 }
 0x5d2   :  { %v1376_v44 = vpop.eup %1375 }
 0x5d3   :  { %v829_v45 = vmul.f32 %v1376_v44, %v1372_v20 }
 0x5d5   :  { %1303 = vmatmul.msk.f32.vlgmr.msra.gmra.mxu0 %vm302_vm1, %v829_v45  ;;  %1306 = vmatmul.msk.f32.vlgmr.msra.gmra.mxu2 %vm158_vm0, %v1702_v7 }
 0x5dd   :  { %1307 = vmatmul.msk.f32.gmra.mxu2 %vm158_vm0, %v1704_v9  ;;  %1311 = vmatmul.msk.f32.vlgmr.msrb.gmra.mxu0 %vm158_vm0, %v1702_v7 }
 0x5e5   :  { %1312 = vmatmul.msk.f32.gmra.mxu0 %vm158_vm0, %v1704_v9 }
 0x650   :  { %v850_v52 = vpop.f32.mrf.mxu2 }
 0x651   :  { %1304 = vmatmul.msk.f32.vlgmr.msrb.gmra.mxu1 %vm158_vm0, %v850_v52 }
 0x652   :  { %v873_v53 = vpop.f32.mrf.mxu0  ;;  %1154 = vmatpush.msrb.mxu1 %v1135_v26 }
 0x654   :  { %1155 = vmatpush.msrb.mxu1 %v1134_v27 }
 0x656   :  { %1156 = vmatpush.msrb.mxu1 %v1133_v28 }
 0x658   :  { %v939_v54 = vpop.f32.mrf.mxu2  ;;  %1157 = vmatpush.msrb.mxu1 %v1132_v35 }
 0x659   :  { %1305 = vmatmul.msk.f32.gmra.mxu1 %vm158_vm0, %v873_v53  ;;  %v940_v56 = vadd.f32 %v1348_v55, %v939_v54 }
 0x65a   :  { %v1005_v22 = vpop.f32.mrf.mxu0 }
 0x65b   :  { %v1006_v23 = vadd.f32 %v1349_v21, %v1005_v22 }
 0x65d   :  { %1103 = vmatpush.msrb.mxu3 %v1006_v23 }
 0x660   :  { %v942_v57 = vpop.f32.mrf.mxu2 }
 0x661   :  { %v943_v58 = vadd.f32 %v1348_v55, %v942_v57  ;;  %1314 = vmatmul.msk.f32.vlgmr.msra.gmra.mxu1 %vm158_vm0, %v940_v56 }
 0x662   :  { %v1008_v24 = vpop.f32.mrf.mxu0 }
 0x663   :  { %1316 = vmatmul.msk.f32.vlgmr.msrb.gmra.mxu2 %vm158_vm0, %v943_v58  ;;  %v1009_v25 = vadd.f32 %v1349_v21, %v1008_v24 }
 0x665   :  { %1126 = vmatpush.msra.mxu0 %v1009_v25 }
 0x6ce   :  { %v904_v61 = vpop.f32.mrf.mxu1 }
 0x6cf   :  { %v1809_v62 = vadd.f32 %v904_v61, %v652_v60 }
 0x6d6   :  { %v907_v0 = vpop.f32.mrf.mxu1 }
 0x6d7   :  { %v1813_v1 = vadd.f32 %v907_v0, %v655_v63 }
 0x6de   :  { %v1034_v2 = vpop.f32.mrf.mxu1 }
 0x6df   :  { %v1063_v4 = vsel %vm302_vm1, %v1034_v2, -inf }
 0x6e0   :  { %1064 = vmax.xlane.f32.xlu0 %v1063_v4 }
 0x6e6   :  { %v1060_v6 = vpop.f32.mrf.mxu2 }
 0x6e7   :  { %v1066_v8 = vsel %vm302_vm1, %v1060_v6, -inf }
 0x6e8   :  { %1067 = vmax.xlane.f32.xlu1 %v1066_v8 }
 0x753   :  { %v1065_v5 = vpop.xlane.xlu0 %1064 }
 0x754   :  { %v1069_v12 = vsub.f32 %v1034_v2, %v1065_v5 }
 0x756   :  { %v1071_v13 = vmul.f32 1.442695, %v1069_v12 }
 0x758   :  { %1377 = vpow2.f32 %v1071_v13 }
 0x75b   :  { %v1068_v14 = vpop.xlane.xlu1 %1067 }
 0x75c   :  { %v1070_v15 = vsub.f32 %v1060_v6, %v1068_v14 }
 0x75e   :  { %v1378_v16 = vpop.eup %1377  ;;  %v1073_v17 = vmul.f32 1.442695, %v1070_v15 }
 0x75f   :  { %v1075_v18 = vsel %vm302_vm1, %v1378_v16, 0.0 }
 0x760   :  { %1379 = vpow2.f32 %v1073_v17  ;;  %1076 = vadd.xlane.f32.xlu2 %v1075_v18 }
 0x766   :  { %v1380_v19 = vpop.eup %1379 }
 0x767   :  { %v1078_v20 = vsel %vm302_vm1, %v1380_v19, 0.0 }
 0x768   :  { %1079 = vadd.xlane.f32.xlu0 %v1078_v20  ;;  %v1352_v20 = vld [vmem:[%s1865_s10] ss:$0 sm:$0xff] }
 0x7d3   :  { %v1077_v29 = vpop.xlane.xlu2 %1076 }
 0x7d4   :  { %1381 = vrcp.f32 %v1077_v29 }
 0x7da   :  { %v1382_v30 = vpop.eup %1381 }
 0x7db   :  { %v1083_v31 = vmul.f32 %v1382_v30, %v1378_v16  ;;  %v1080_v32 = vpop.xlane.xlu0 %1079  ;;  %v1351_v16 = vld [vmem:[%s1864_s9] ss:$0 sm:$0xff]  ;;  %s1605_s9 = smov [#allocation14]  }
 0x7dc   :  { %1383 = vrcp.f32 %v1080_v32  ;;  %s1244_s21 = sshll.u32 %s1605_s9, 4  ;;  %s1245_s21 = int_to_ptr.vmem [resolvable:$true] %s1244_s21 }
 0x7dd   :  { %1317 = vmatmul.msk.f32.vlgmr.msrb.gmra.mxu3 %vm302_vm1, %v1083_v31  ;;  %1385 = vrcp.f32 %v1604_v49 }
 0x7e2   :  { %v1384_v33 = vpop.eup %1383 }
 0x7e3   :  { %v1084_v34 = vmul.f32 %v1384_v33, %v1380_v19  ;;  %v1386_v50 = vpop.eup %1385 }
 0x7e4   :  { %v1182_v51 = vmul.f32 32.0, %v1386_v50  ;;  %vm1186_vm2 = vweird.f32 %v1386_v50 }
 0x7e5   :  { %1318 = vmatmul.msk.f32.vlgmr.msra.gmra.mxu0 %vm302_vm1, %v1084_v34 }
 0x7e6   :  { %v1183_v52 = vsub.f32 1.0, %v1182_v51 }
 0x7e8   :  { %v1184_v53 = vmul.f32 %v1386_v50, %v1183_v52 }
 0x7ea   :  { %v1185_v54 = vadd.f32 %v1386_v50, %v1184_v53 }
 0x860   :  { %v1105_v36 = vpop.f32.mrf.mxu3 }
 0x861   :  { %1319 = vmatmul.msk.f32.vlgmr.msrb.gmra.mxu1 %vm158_vm0, %v1105_v36 }
 0x862   :  { %v1128_v37 = vpop.f32.mrf.mxu0 }
 0x869   :  { %1320 = vmatmul.msk.f32.gmra.mxu1 %vm158_vm0, %v1128_v37 }
 0x8de   :  { %v1159_v39 = vpop.f32.mrf.mxu1 }
 0x8df   :  { %v1165_v40 = vadd.f32 %v1159_v39, %v1809_v62 }
 0x8e1   :  { %v1171_v41 = vadd.f32 %v1350_v38, %v1165_v40 }
 0x8e3   :  { %v1173_v42 = vadd.f32 %v1171_v41, %v1702_v7  ;;  %v1187_v7 = vsel %vm1186_vm2, %v1386_v50, %v1185_v54 }
 0x8e5   :  { %v1175_v43 = vsel %vm158_vm0, %v1173_v42, 0.0 }
 0x8e6   :  { %1176 = vadd.xlane.f32.xlu1 %v1175_v43  ;;  %v1162_v44 = vpop.f32.mrf.mxu1 }
 0x8e7   :  { %v1166_v45 = vadd.f32 %v1162_v44, %v1813_v1 }
 0x8e9   :  { %v1172_v46 = vadd.f32 %v1350_v38, %v1166_v45 }
 0x8eb   :  { %v1174_v47 = vadd.f32 %v1172_v46, %v1704_v9 }
 0x8ed   :  { %v1178_v48 = vsel %vm158_vm0, %v1174_v47, 0.0 }
 0x8ee   :  { %1179 = vadd.xlane.f32.xlu2 %v1178_v48 }
 0x959   :  { %v1177_v55 = vpop.xlane.xlu1 %1176 }
 0x95a   :  { %v1188_v56 = vmul.f32 %v1187_v7, %v1177_v55 }
 0x95c   :  { %v1190_v57 = vsub.f32 %v1173_v42, %v1188_v56 }
 0x95e   :  { %v1192_v58 = vmul.f32 %v1190_v57, %v1190_v57 }
 0x960   :  { %v1194_v59 = vsel %vm158_vm0, %v1192_v58, 0.0 }
 0x961   :  { %1195 = vadd.xlane.f32.xlu0 %v1194_v59  ;;  %v1180_v9 = vpop.xlane.xlu2 %1179 }
 0x962   :  { %v1189_v60 = vmul.f32 %v1187_v7, %v1180_v9 }
 0x964   :  { %v1191_v61 = vsub.f32 %v1174_v47, %v1189_v60 }
 0x966   :  { %v1193_v62 = vmul.f32 %v1191_v61, %v1191_v61 }
 0x968   :  { %v1197_v63 = vsel %vm158_vm0, %v1193_v62, 0.0 }
 0x969   :  { %1198 = vadd.xlane.f32.xlu1 %v1197_v63 }
 0x9d4   :  { %v1196_v0 = vpop.xlane.xlu0 %1195 }
 0x9d5   :  { %v1200_v1 = vmul.f32 %v1196_v0, %v1187_v7 }
 0x9d7   :  { %v1202_v2 = vadd.f32 1e-05, %v1200_v1 }
 0x9d9   :  { %1387 = vrsqrt.f32 %v1202_v2  ;;  %vm1210_vm4 = vweird.f32 %v1202_v2 }
 0x9dc   :  { %v1199_v4 = vpop.xlane.xlu1 %1198 }
 0x9dd   :  { %v1201_v6 = vmul.f32 %v1199_v4, %v1187_v7 }
 0x9df   :  { %v1388_v8 = vpop.eup %1387  ;;  %v1203_v10 = vadd.f32 1e-05, %v1201_v6 }
 0x9e0   :  { %v1205_v3 = vmul.f32 %v1388_v8, %v1202_v2  ;;  %vm1211_vm3 = vweird.f32 %v1388_v8 }
 0x9e1   :  { %1389 = vrsqrt.f32 %v1203_v10  ;;  %vm1212_vm5 = vmor %vm1210_vm4, %vm1211_vm3  ;;  %vm1220_vm7 = vweird.f32 %v1203_v10 }
 0x9e2   :  { %v1206_v11 = vmul.f32 %v1388_v8, %v1205_v3 }
 0x9e4   :  { %v1207_v5 = vmul.f32 0.5, %v1206_v11 }
 0x9e6   :  { %v1208_v12 = vsub.f32 1.5, %v1207_v5 }
 0x9e7   :  { %v1390_v13 = vpop.eup %1389 }
 0x9e8   :  { %v1209_v14 = vmul.f32 %v1388_v8, %v1208_v12  ;;  %v1215_v15 = vmul.f32 %v1390_v13, %v1203_v10  ;;  %vm1221_vm6 = vweird.f32 %v1390_v13 }
 0x9e9   :  { %vm1222_vm8 = vmor %vm1220_vm7, %vm1221_vm6 }
 0x9ea   :  { %v1213_v17 = vsel %vm1212_vm5, %v1388_v8, %v1209_v14  ;;  %v1216_v18 = vmul.f32 %v1390_v13, %v1215_v15 }
 0x9eb   :  { %v1224_v19 = vmul.f32 %v1213_v17, %v1190_v57 }
 0x9ec   :  { %v1217_v21 = vmul.f32 0.5, %v1216_v18 }
 0x9ed   :  { %v1230_v22 = vmul.f32 %v1351_v16, %v1224_v19 }
 0x9ee   :  { %v1218_v23 = vsub.f32 1.5, %v1217_v21 }
 0x9ef   :  { %v1236_v24 = vadd.f32 %v1352_v20, %v1230_v22 }
 0x9f0   :  { %v1219_v25 = vmul.f32 %v1390_v13, %v1218_v23 }
 0x9f1   :  { %1238 = vst.msk [vmem:[#allocation14] sm:$0xff] %vm158_vm0, %v1236_v24 }
 0x9f2   :  { %v1223_v26 = vsel %vm1222_vm8, %v1390_v13, %v1219_v25 }
 0x9f3   :  { %v1225_v27 = vmul.f32 %v1223_v26, %v1191_v61 }
 0x9f5   :  { %v1231_v28 = vmul.f32 %v1351_v16, %v1225_v27 }
 0x9f7   :  { %v1237_v29 = vadd.f32 %v1352_v20, %v1231_v28 }
 0x9f9   :  { %1239 = vst.msk [vmem:[#allocation14 + $0x8] sm:$0xff] %vm158_vm0, %v1237_v29 }
 0x9fa   :  { %1252 = dma.vmem_to_hbm [thread:$0]  %s1245_s21, 256, %s1247_s24, [#allocation4], %s1594_s25, %s1594_s25, %s1595_s26  }
 0x9fb   :  { %1591 = dma.done.wait [#allocation4], 256  }
 0x9fc   :  { %1592 = vsyncadd [#allocation4], 4294967040 }
 0x9fd   :  { %1257 = vsyncpa [#allocation3], 1 }
 0x9fe   :  { %1258 = vsyncpa [#allocation6], 1 }
 0x9ff   :  { %1259 = vsyncpa [#allocation9], 1 }
 0xa00   :  { %1260 = vsyncpa [#allocation12], 1 }
 0xa01   :  { %1261 = vsyncpa [#allocation4], 1 }

</bundles_post_ra>
